<compile_context>
chip_gen: v7x
topology: tpu7x:2x2x1
jax: 0.10.0
libtpu: 0.0.40
codegen_flags: <defaults>
</compile_context>

<pallas_src>
import math
import jax
import jax.numpy as jnp
from jax import lax
from jax.experimental import pallas as pl
from jax.experimental.pallas import tpu as pltpu


def _round_up(x, m):
    return ((x + m - 1) // m) * m


def _vmem_capacity_bytes():
    try:
        return int(pltpu.get_tpu_info().vmem_capacity_bytes)
    except Exception:
        return 64 * 1024 * 1024            # conservative (v7x per-core) fallback


def _choose_tiles(B, T, S, D, csize, msize, vmem_cap):
    """Pick (b_blk, t_tile, t_chunk, hs_buffers) under a generation-aware budget.

    The wrapper pre-pads so that T % (32 // csize) == 0 and (B <= 8 or B % 8 == 0).
    """
    t_step = 32 // csize                   # sublane packing of compute_dtype
    b_blk = 8 if (B >= 8 and B % 8 == 0) else B
    hs_block = b_blk * S * D * 4           # f32 input block
    # h_s's block index only changes on the outer batch axis: single-buffer it
    # when large so the reservation does not eat half of a v7x-sized VMEM.
    hs_bufs = 1 if hs_block > vmem_cap // 8 else 2
    budget = int(vmem_cap * 0.70)

    def footprint(t_tile, t_chunk):
        weights = 2 * 4 * D * D * msize + 4 * 2 * max(D, 128) * 4
        ht = 2 * b_blk * t_tile * D * 4                     # double-buffered h_t
        outs = 2 * t_tile * b_blk * (D + S) * 4             # double-buffered outputs
        scratch = b_blk * (S * D + t_tile * D + t_tile * S) * csize
        chunk = (2 * b_blk * t_chunk * S * D * csize        # tanh arg + product
                 + 4 * b_blk * t_chunk * S * 4)             # f32 scores/exp/align
        return weights + ht + hs_bufs * hs_block + outs + scratch + chunk

    cap = min(T, 512)
    cands = [t for t in range(cap, 0, -t_step) if T % t == 0] or [T]
    choice = None
    for t_tile in cands:
        chunks = [t_tile] + [c for c in range((t_tile // t_step) * t_step, 0, -t_step)
                             if t_tile % c == 0]
        for t_chunk in chunks:
            if footprint(t_tile, t_chunk) <= budget:
                choice = (t_tile, t_chunk)
                break
        if choice is not None:
            break
    if choice is None:
        # TODO(synk): for very large S*D even the smallest legal tile overflows
        # the budget; tiling the source (S) axis would be needed here.
        t_tile = cands[-1]
        t_chunk = t_step if t_tile % t_step == 0 else t_tile
        choice = (t_tile, t_chunk)
    t_tile, t_chunk = choice
    return b_blk, t_tile, t_chunk, hs_bufs


def _make_kernel(b_blk, t_tile, S, D, t_chunk, compute_dtype, mxu_dtype):
    n_chunks = t_tile // t_chunk
    f32 = jnp.float32

    def kernel(h_t_ref, h_s_ref, wq_ref, bq_ref, wc_ref, v_ref,
               woc_ref, woh_ref, bo_ref,
               attn_ref, align_ref,
               uh_ref, wq_s_ref, al_ref):
        # ---- U_a h_s: computed once per batch block (the T axis is the inner,
        # sequential grid axis) and cached in compute_dtype VMEM scratch.
        @pl.when(pl.program_id(1) == 0)
        def _():
            hs_flat = h_s_ref[...].astype(mxu_dtype).reshape(b_blk * S, D)
            uh = jnp.dot(hs_flat, wc_ref[...], preferred_element_type=f32)
            uh_ref[...] = uh.reshape(b_blk, S, D).astype(compute_dtype)

        # ---- W_q h_t + b_q: one matmul per tile (MXU M = b_blk * t_tile).
        ht_flat = h_t_ref[...].astype(mxu_dtype).reshape(b_blk * t_tile, D)
        wq = jnp.dot(ht_flat, wq_ref[...], preferred_element_type=f32)
        wq_s_ref[...] = ((wq + bq_ref[...])
                         .reshape(b_blk, t_tile, D).astype(compute_dtype))

        v_row = v_ref[...]                                   # (1, D), compute_dtype

        # ---- scores / softmax, chunked over T so the live (b_blk, t_chunk, S, D)
        # tanh intermediate stays inside the VMEM budget.  No f32 promotion of
        # the big intermediate: only the (b_blk, t_chunk, S) scores go to f32.
        def chunk_body(ci, carry):
            off = ci * t_chunk
            if n_chunks > 1:
                off = pl.multiple_of(off, t_chunk)
            wq_c = wq_s_ref[:, pl.ds(off, t_chunk), :]       # (b, tc, D)
            uh_c = uh_ref[...]                               # (b, S,  D)
            wquh = jnp.tanh(wq_c[:, :, None, :] + uh_c[:, None, :, :])
            scores = jnp.sum(wquh * v_row, axis=-1).astype(f32)   # (b, tc, S)
            m = jnp.max(scores, axis=-1, keepdims=True)
            e = jnp.exp(scores - m)
            # approx reciprocal (EUP vrcp): rows sum to 1 only approximately.
            align_c = e * pl.reciprocal(jnp.sum(e, axis=-1, keepdims=True),
                                        approx=True)
            al_ref[:, pl.ds(off, t_chunk), :] = align_c.astype(compute_dtype)
            return carry

        if n_chunks == 1:
            chunk_body(0, 0)
        else:
            lax.fori_loop(0, n_chunks, chunk_body, 0, unroll=n_chunks <= 8)

        # ---- context c = align @ h_s, hoisted out of the chunk loop
        # (batched MXU matmul with M = t_tile, h_s read once per tile).
        al_m = al_ref[...].astype(mxu_dtype)                 # (b, t_tile, S)
        hs_m = h_s_ref[...].astype(mxu_dtype)                # (b, S, D)
        c = jnp.einsum('bts,bsd->btd', al_m, hs_m, preferred_element_type=f32)

        # ---- linear_out([c, h_t]) = c Wo_c + h_t Wo_h + b_o  (mlp: no final tanh)
        c_flat = c.astype(mxu_dtype).reshape(b_blk * t_tile, D)
        attn = (jnp.dot(c_flat, woc_ref[...], preferred_element_type=f32)
                + jnp.dot(ht_flat, woh_ref[...], preferred_element_type=f32)
                + bo_ref[...]).reshape(b_blk, t_tile, D)

        # ---- store directly in the module's (T, B, ...) output layout.
        # TODO(synk): single swapaxes(0, 1) store blocked on Mosaic transpose support.
        for bi in range(b_blk):
            attn_ref[:, bi:bi + 1, :] = attn[bi][:, None, :].astype(attn_ref.dtype)
            align_ref[:, bi:bi + 1, :] = al_ref[bi][:, None, :].astype(align_ref.dtype)

    return kernel


def global_attention_mlp(h_t, h_s, params, *, compute_dtype=jnp.float32,
                         mxu_dtype=None):
    """GlobalAttention forward (attn_type='mlp', softmax, no mask / coverage).

    h_t: (B, T, D) decoder states (or (B, D) for the one-step path),
    h_s: (B, S, D) encoder states.
    Returns (attn_h (T, B, D), align (T, B, S)); for 2-D h_t returns
    ((B, D), (B, S)) like the PyTorch module.

    compute_dtype drives the tanh/score path and the staging scratch
    (bf16 recommended on v6e/v7x, keep f32 on v5e); mxu_dtype (default:
    compute_dtype) drives the matmul operands (accumulation is always f32).
    """
    one_step = (h_t.ndim == 2)
    if one_step:
        h_t = h_t[:, None, :]
    B, T, D = h_t.shape
    Bs, S, Ds = h_s.shape
    assert B == Bs and D == Ds
    if mxu_dtype is None:
        mxu_dtype = compute_dtype

    csize = jnp.dtype(compute_dtype).itemsize
    msize = jnp.dtype(mxu_dtype).itemsize
    t_step = 32 // csize

    # ---- pad odd T / large odd B so block shapes and chunk offsets stay legal.
    T_p = T if T % t_step == 0 else _round_up(T, t_step)
    B_p = B if (B <= 8 or B % 8 == 0) else _round_up(B, 8)
    if T_p != T or B_p != B:
        h_t = jnp.pad(h_t, ((0, B_p - B), (0, T_p - T), (0, 0)))
        h_s = jnp.pad(h_s, ((0, B_p - B), (0, 0), (0, 0)))

    # ---- weights: pre-transposed (x @ W), pre-cast to the MXU operand dtype so
    # their VMEM blocks shrink too; biases stay f32 (added to f32 accumulators).
    wq = params["wq_t"].astype(mxu_dtype)
    bq = params["bq"].astype(jnp.float32)
    wc = params["wc_t"].astype(mxu_dtype)
    v = params["v"].astype(compute_dtype)
    wo_c = params["wo_t"][:D].astype(mxu_dtype)
    wo_h = params["wo_t"][D:].astype(mxu_dtype)
    bo = params["bo"].astype(jnp.float32)
    # TODO(synk): on v5e, D should ideally be padded to a multiple of 128 for the
    # 128x128 MXU; not done here.

    vmem_cap = _vmem_capacity_bytes()
    b_blk, t_tile, t_chunk, hs_bufs = _choose_tiles(
        B_p, T_p, S, D, csize, msize, vmem_cap)
    grid = (B_p // b_blk, T_p // t_tile)
    # TODO(synk): when B_p // b_blk == 1 the second v7x TensorCore idles; splitting
    # the T axis instead would require a per-core U_a h_s recompute.

    if hs_bufs == 1:
        hs_spec = pl.BlockSpec((b_blk, S, D), lambda b, t: (b, 0, 0),
                               pipeline_mode=pl.Buffered(1))
    else:
        hs_spec = pl.BlockSpec((b_blk, S, D), lambda b, t: (b, 0, 0))

    const = lambda shape: pl.BlockSpec(shape, lambda b, t: (0,) * len(shape))
    kernel = _make_kernel(b_blk, t_tile, S, D, t_chunk, compute_dtype, mxu_dtype)

    attn_h, align = pl.pallas_call(
        kernel,
        out_shape=(jax.ShapeDtypeStruct((T_p, B_p, D), jnp.float32),
                   jax.ShapeDtypeStruct((T_p, B_p, S), jnp.float32)),
        grid_spec=pltpu.PrefetchScalarGridSpec(
            num_scalar_prefetch=0,
            grid=grid,
            in_specs=[
                pl.BlockSpec((b_blk, t_tile, D), lambda b, t: (b, t, 0)),  # h_t
                hs_spec,                                                   # h_s
                const((D, D)),        # W_q^T
                const((1, D)),        # b_q
                const((D, D)),        # W_c^T (U_a)
                const((1, D)),        # v
                const((D, D)),        # W_out^T, context half
                const((D, D)),        # W_out^T, query half
                const((1, D)),        # b_out
            ],
            out_specs=[
                pl.BlockSpec((t_tile, b_blk, D), lambda b, t: (t, b, 0)),
                pl.BlockSpec((t_tile, b_blk, S), lambda b, t: (t, b, 0)),
            ],
            scratch_shapes=[
                pltpu.VMEM((b_blk, S, D), compute_dtype),       # cached U_a h_s
                pltpu.VMEM((b_blk, t_tile, D), compute_dtype),  # W_q h_t + b_q
                pltpu.VMEM((b_blk, t_tile, S), compute_dtype),  # align staging
            ],
        ),
        compiler_params=pltpu.CompilerParams(
            # T must stay sequential ("arbitrary"): the U_a h_s cache is only
            # (re)computed on the first T step of each batch block.
            dimension_semantics=("parallel", "arbitrary"),
            vmem_limit_bytes=int(vmem_cap * 0.85)),
    )(h_t, h_s, wq, bq, wc, v, wo_c, wo_h, bo)

    if T_p != T or B_p != B:
        attn_h = attn_h[:T, :B]
        align = align[:T, :B]
    if one_step:
        return attn_h[0], align[0]
    return attn_h, align


def _reference(h_t, h_s, params):
    """Pure-JAX reference mirroring the PyTorch forward (mlp score + softmax)."""
    wq, bq, wc, v, wo, bo = (params["wq_t"], params["bq"], params["wc_t"],
                             params["v"], params["wo_t"], params["bo"])
    wqh = h_t @ wq + bq[0]                               # (B, T, D)
    uh = h_s @ wc                                        # (B, S, D)
    wquh = jnp.tanh(wqh[:, :, None, :] + uh[:, None, :, :])
    scores = jnp.einsum("btsd,d->bts", wquh, v[0])
    align = jax.nn.softmax(scores, axis=-1)
    c = jnp.einsum("bts,bsd->btd", align, h_s)
    concat = jnp.concatenate([c, h_t], axis=-1)
    attn_h = concat @ wo + bo[0]
    return jnp.transpose(attn_h, (1, 0, 2)), jnp.transpose(align, (1, 0, 2))


if __name__ == "__main__":
    B, T, S, D = 2, 8, 16, 128
    key = jax.random.PRNGKey(0)
    k = iter(jax.random.split(key, 10))

    h_t = jax.random.normal(next(k), (B, T, D), jnp.float32)   # decoder output
    h_s = jax.random.normal(next(k), (B, S, D), jnp.float32)   # encoder context

    # Synthetic parameters (shapes per GlobalAttention.__init__, attn_type='mlp'):
    # linear_query(D,D,bias), linear_context(D,D,no bias), v(D,1,no bias),
    # linear_out(2D,D,bias).  Weights are pre-transposed for x @ W.
    scale = 1.0 / math.sqrt(D)
    params = {
        "wq_t": scale * jax.random.normal(next(k), (D, D), jnp.float32),
        "bq":   scale * jax.random.normal(next(k), (1, D), jnp.float32),
        "wc_t": scale * jax.random.normal(next(k), (D, D), jnp.float32),
        "v":    scale * jax.random.normal(next(k), (1, D), jnp.float32),
        "wo_t": scale * jax.random.normal(next(k), (2 * D, D), jnp.float32),
        "bo":   scale * jax.random.normal(next(k), (1, D), jnp.float32),
    }

    ref_attn, ref_align = _reference(h_t, h_s, params)

    # f32 path (default; v5e-friendly).  Tolerance covers the approximate
    # reciprocal used for the softmax denominator.
    attn_h, align = global_attention_mlp(h_t, h_s, params)
    jax.block_until_ready((attn_h, align))
    assert attn_h.shape == (T, B, D) and align.shape == (T, B, S)
    assert jnp.allclose(attn_h, ref_attn, atol=1e-2, rtol=1e-2)
    assert jnp.allclose(align, ref_align, atol=1e-2, rtol=1e-2)

    # bf16 score + MXU path (recommended on v6e/v7x).
    attn_bf, align_bf = global_attention_mlp(h_t, h_s, params,
                                             compute_dtype=jnp.bfloat16)
    jax.block_until_ready((attn_bf, align_bf))
    assert jnp.allclose(attn_bf, ref_attn, atol=2.5e-1, rtol=2.5e-1)
    assert jnp.allclose(align_bf, ref_align, atol=2.5e-1, rtol=2.5e-1)

    print("KERNEL_OK")
</pallas_src>

<mosaic_0001>
module attributes {stable_mosaic.version = 11 : i64} {
  func.func @kernel(%arg0: i32, %arg1: i32, %arg2: memref<2x8x128xf32, #tpu.memory_space<vmem>>, %arg3: memref<2x16x128xf32, #tpu.memory_space<vmem>>, %arg4: memref<128x128xf32, #tpu.memory_space<vmem>>, %arg5: memref<1x128xf32, #tpu.memory_space<vmem>>, %arg6: memref<128x128xf32, #tpu.memory_space<vmem>>, %arg7: memref<1x128xf32, #tpu.memory_space<vmem>>, %arg8: memref<128x128xf32, #tpu.memory_space<vmem>>, %arg9: memref<128x128xf32, #tpu.memory_space<vmem>>, %arg10: memref<1x128xf32, #tpu.memory_space<vmem>>, %arg11: memref<8x2x128xf32, #tpu.memory_space<vmem>>, %arg12: memref<8x2x16xf32, #tpu.memory_space<vmem>>, %arg13: memref<2x16x128xf32, #tpu.memory_space<vmem>>, %arg14: memref<2x8x128xf32, #tpu.memory_space<vmem>>, %arg15: memref<2x8x16xf32, #tpu.memory_space<vmem>>) attributes {dimension_semantics = [#tpu.dimension_semantics<parallel>, #tpu.dimension_semantics<arbitrary>], iteration_bounds = array<i64: 1, 1>, scalar_prefetch = 0 : i64, scratch_operands = 3 : i64, tpu.core_type = #tpu.core_type<tc>, window_params = [{transform_indices = @transform_0, window_bounds = array<i64: 2, 8, 128>}, {transform_indices = @transform_1, window_bounds = array<i64: 2, 16, 128>}, {pipeline_mode = #tpu.pipeline_mode<synchronous>, transform_indices = @transform_2, window_bounds = array<i64: 128, 128>}, {pipeline_mode = #tpu.pipeline_mode<synchronous>, transform_indices = @transform_3, window_bounds = array<i64: 1, 128>}, {pipeline_mode = #tpu.pipeline_mode<synchronous>, transform_indices = @transform_4, window_bounds = array<i64: 128, 128>}, {pipeline_mode = #tpu.pipeline_mode<synchronous>, transform_indices = @transform_5, window_bounds = array<i64: 1, 128>}, {pipeline_mode = #tpu.pipeline_mode<synchronous>, transform_indices = @transform_6, window_bounds = array<i64: 128, 128>}, {pipeline_mode = #tpu.pipeline_mode<synchronous>, transform_indices = @transform_7, window_bounds = array<i64: 128, 128>}, {pipeline_mode = #tpu.pipeline_mode<synchronous>, transform_indices = @transform_8, window_bounds = array<i64: 1, 128>}, {transform_indices = @transform_9, window_bounds = array<i64: 8, 2, 128>}, {transform_indices = @transform_10, window_bounds = array<i64: 8, 2, 16>}]} {
    %c0_i32 = arith.constant 0 : i32
    %0 = arith.cmpi eq, %arg1, %c0_i32 : i32
    %1 = arith.extui %0 : i1 to i32
    %c0_i32_0 = arith.constant 0 : i32
    %2 = arith.cmpi ne, %1, %c0_i32_0 : i32
    scf.if %2 {
      %c0_56 = arith.constant 0 : index
      %c0_57 = arith.constant 0 : index
      %c0_58 = arith.constant 0 : index
      %65 = vector.load %arg3[%c0_56, %c0_57, %c0_58] : memref<2x16x128xf32, #tpu.memory_space<vmem>>, vector<2x16x128xf32>
      %66 = vector.shape_cast %65 : vector<2x16x128xf32> to vector<32x128xf32>
      %c0_59 = arith.constant 0 : index
      %c0_60 = arith.constant 0 : index
      %67 = vector.load %arg6[%c0_59, %c0_60] : memref<128x128xf32, #tpu.memory_space<vmem>>, vector<128x128xf32>
      %cst_61 = arith.constant dense<0.000000e+00> : vector<32x128xf32>
      %68 = tpu.matmul %66, %67, %cst_61 {dimension_numbers = #tpu.dot_dimension_numbers<[1], [0], [0], [1], [0, 0, 1, 1], [], []>} : vector<32x128xf32>, vector<128x128xf32>, vector<32x128xf32> -> vector<32x128xf32>
      %69 = vector.shape_cast %68 : vector<32x128xf32> to vector<2x16x128xf32>
      %c0_62 = arith.constant 0 : index
      %c0_63 = arith.constant 0 : index
      %c0_64 = arith.constant 0 : index
      %70 = vector.load %arg13[%c0_62, %c0_63, %c0_64] : memref<2x16x128xf32, #tpu.memory_space<vmem>>, vector<2x16x128xf32>
      tpu.vector_store %arg13[%c0_62, %c0_63, %c0_64], %69 {strides = array<i32>} : memref<2x16x128xf32, #tpu.memory_space<vmem>>, vector<2x16x128xf32>,
    } else {
    }
    %c0 = arith.constant 0 : index
    %c0_1 = arith.constant 0 : index
    %c0_2 = arith.constant 0 : index
    %3 = vector.load %arg2[%c0, %c0_1, %c0_2] : memref<2x8x128xf32, #tpu.memory_space<vmem>>, vector<2x8x128xf32>
    %4 = vector.shape_cast %3 : vector<2x8x128xf32> to vector<16x128xf32>
    %c0_3 = arith.constant 0 : index
    %c0_4 = arith.constant 0 : index
    %5 = vector.load %arg4[%c0_3, %c0_4] : memref<128x128xf32, #tpu.memory_space<vmem>>, vector<128x128xf32>
    %cst = arith.constant dense<0.000000e+00> : vector<16x128xf32>
    %6 = tpu.matmul %4, %5, %cst {dimension_numbers = #tpu.dot_dimension_numbers<[1], [0], [0], [1], [0, 0, 1, 1], [], []>} : vector<16x128xf32>, vector<128x128xf32>, vector<16x128xf32> -> vector<16x128xf32>
    %c0_5 = arith.constant 0 : index
    %c0_6 = arith.constant 0 : index
    %7 = vector.load %arg5[%c0_5, %c0_6] : memref<1x128xf32, #tpu.memory_space<vmem>>, vector<1x128xf32>
    %8 = vector.broadcast %7 : vector<1x128xf32> to vector<16x128xf32>
    %9 = arith.addf %6, %8 : vector<16x128xf32>
    %10 = vector.shape_cast %9 : vector<16x128xf32> to vector<2x8x128xf32>
    %c0_7 = arith.constant 0 : index
    %c0_8 = arith.constant 0 : index
    %c0_9 = arith.constant 0 : index
    %11 = vector.load %arg14[%c0_7, %c0_8, %c0_9] : memref<2x8x128xf32, #tpu.memory_space<vmem>>, vector<2x8x128xf32>
    tpu.vector_store %arg14[%c0_7, %c0_8, %c0_9], %10 {strides = array<i32>} : memref<2x8x128xf32, #tpu.memory_space<vmem>>, vector<2x8x128xf32>,
    %c0_10 = arith.constant 0 : index
    %c0_11 = arith.constant 0 : index
    %12 = vector.load %arg7[%c0_10, %c0_11] : memref<1x128xf32, #tpu.memory_space<vmem>>, vector<1x128xf32>
    %c0_12 = arith.constant 0 : index
    %c0_13 = arith.constant 0 : index
    %c0_14 = arith.constant 0 : index
    %13 = vector.load %arg14[%c0_12, %c0_13, %c0_14] : memref<2x8x128xf32, #tpu.memory_space<vmem>>, vector<2x8x128xf32>
    %c0_15 = arith.constant 0 : index
    %c0_16 = arith.constant 0 : index
    %c0_17 = arith.constant 0 : index
    %14 = vector.load %arg13[%c0_15, %c0_16, %c0_17] : memref<2x16x128xf32, #tpu.memory_space<vmem>>, vector<2x16x128xf32>
    %15 = vector.shape_cast %13 : vector<2x8x128xf32> to vector<2x8x1x128xf32>
    %16 = vector.shape_cast %14 : vector<2x16x128xf32> to vector<2x1x16x128xf32>
    %17 = vector.broadcast %15 : vector<2x8x1x128xf32> to vector<2x8x16x128xf32>
    %18 = vector.broadcast %16 : vector<2x1x16x128xf32> to vector<2x8x16x128xf32>
    %19 = arith.addf %17, %18 : vector<2x8x16x128xf32>
    %20 = math.tanh %19 : vector<2x8x16x128xf32>
    %21 = vector.shape_cast %12 : vector<1x128xf32> to vector<1x1x1x128xf32>
    %22 = vector.broadcast %21 : vector<1x1x1x128xf32> to vector<2x8x16x128xf32>
    %23 = arith.mulf %20, %22 : vector<2x8x16x128xf32>
    %cst_18 = arith.constant dense<0.000000e+00> : vector<2x8x16xf32>
    %24 = vector.multi_reduction <add>, %23, %cst_18 [3] : vector<2x8x16x128xf32> to vector<2x8x16xf32>
    %cst_19 = arith.constant dense<0xFF800000> : vector<2x8xf32>
    %25 = vector.multi_reduction <maximumf>, %24, %cst_19 [2] : vector<2x8x16xf32> to vector<2x8xf32>
    %26 = vector.shape_cast %25 : vector<2x8xf32> to vector<2x8x1xf32>
    %27 = vector.broadcast %26 : vector<2x8x1xf32> to vector<2x8x16xf32>
    %28 = arith.subf %24, %27 : vector<2x8x16xf32>
    %29 = math.exp %28 : vector<2x8x16xf32>
    %cst_20 = arith.constant dense<0.000000e+00> : vector<2x8xf32>
    %30 = vector.multi_reduction <add>, %29, %cst_20 [2] : vector<2x8x16xf32> to vector<2x8xf32>
    %31 = vector.shape_cast %30 : vector<2x8xf32> to vector<2x8x1xf32>
    %32 = tpu.reciprocal %31 {approx = true} : vector<2x8x1xf32> -> vector<2x8x1xf32>
    %33 = vector.broadcast %32 : vector<2x8x1xf32> to vector<2x8x16xf32>
    %34 = arith.mulf %29, %33 : vector<2x8x16xf32>
    %c0_21 = arith.constant 0 : index
    %c0_22 = arith.constant 0 : index
    %c0_23 = arith.constant 0 : index
    %35 = vector.load %arg15[%c0_21, %c0_22, %c0_23] : memref<2x8x16xf32, #tpu.memory_space<vmem>>, vector<2x8x16xf32>
    tpu.vector_store %arg15[%c0_21, %c0_22, %c0_23], %34 {strides = array<i32>} : memref<2x8x16xf32, #tpu.memory_space<vmem>>, vector<2x8x16xf32>,
    %c0_24 = arith.constant 0 : index
    %c0_25 = arith.constant 0 : index
    %c0_26 = arith.constant 0 : index
    %36 = vector.load %arg15[%c0_24, %c0_25, %c0_26] : memref<2x8x16xf32, #tpu.memory_space<vmem>>, vector<2x8x16xf32>
    %c0_27 = arith.constant 0 : index
    %c0_28 = arith.constant 0 : index
    %c0_29 = arith.constant 0 : index
    %37 = vector.load %arg3[%c0_27, %c0_28, %c0_29] : memref<2x16x128xf32, #tpu.memory_space<vmem>>, vector<2x16x128xf32>
    "tpu.trace_start"() <{level = 10 : i32, message = "bts,bsd->btd"}> : () -> ()
    %cst_30 = arith.constant dense<0.000000e+00> : vector<2x8x128xf32>
    %38 = tpu.matmul %36, %37, %cst_30 {dimension_numbers = #tpu.dot_dimension_numbers<[2], [1], [1], [2], [0, 0, 0, 1, 1, 2], [0], [0]>} : vector<2x8x16xf32>, vector<2x16x128xf32>, vector<2x8x128xf32> -> vector<2x8x128xf32>
    "tpu.trace_stop"() : () -> ()
    %39 = vector.shape_cast %38 : vector<2x8x128xf32> to vector<16x128xf32>
    %c0_31 = arith.constant 0 : index
    %c0_32 = arith.constant 0 : index
    %40 = vector.load %arg8[%c0_31, %c0_32] : memref<128x128xf32, #tpu.memory_space<vmem>>, vector<128x128xf32>
    %cst_33 = arith.constant dense<0.000000e+00> : vector<16x128xf32>
    %41 = tpu.matmul %39, %40, %cst_33 {dimension_numbers = #tpu.dot_dimension_numbers<[1], [0], [0], [1], [0, 0, 1, 1], [], []>} : vector<16x128xf32>, vector<128x128xf32>, vector<16x128xf32> -> vector<16x128xf32>
    %c0_34 = arith.constant 0 : index
    %c0_35 = arith.constant 0 : index
    %42 = vector.load %arg9[%c0_34, %c0_35] : memref<128x128xf32, #tpu.memory_space<vmem>>, vector<128x128xf32>
    %cst_36 = arith.constant dense<0.000000e+00> : vector<16x128xf32>
    %43 = tpu.matmul %4, %42, %cst_36 {dimension_numbers = #tpu.dot_dimension_numbers<[1], [0], [0], [1], [0, 0, 1, 1], [], []>} : vector<16x128xf32>, vector<128x128xf32>, vector<16x128xf32> -> vector<16x128xf32>
    %44 = arith.addf %41, %43 : vector<16x128xf32>
    %c0_37 = arith.constant 0 : index
    %c0_38 = arith.constant 0 : index
    %45 = vector.load %arg10[%c0_37, %c0_38] : memref<1x128xf32, #tpu.memory_space<vmem>>, vector<1x128xf32>
    %46 = vector.broadcast %45 : vector<1x128xf32> to vector<16x128xf32>
    %47 = arith.addf %44, %46 : vector<16x128xf32>
    %48 = vector.shape_cast %47 : vector<16x128xf32> to vector<2x8x128xf32>
    %49 = vector.extract_strided_slice %48 {offsets = [0, 0, 0], sizes = [1, 8, 128], strides = [1, 1, 1]} : vector<2x8x128xf32> to vector<1x8x128xf32>
    %50 = vector.shape_cast %49 : vector<1x8x128xf32> to vector<8x128xf32>
    %51 = vector.shape_cast %50 : vector<8x128xf32> to vector<8x1x128xf32>
    %c0_39 = arith.constant 0 : index
    %c0_40 = arith.constant 0 : index
    %c0_41 = arith.constant 0 : index
    %52 = vector.load %arg11[%c0_39, %c0_40, %c0_41] : memref<8x2x128xf32, #tpu.memory_space<vmem>>, vector<8x1x128xf32>
    tpu.vector_store %arg11[%c0_39, %c0_40, %c0_41], %51 {strides = array<i32>} : memref<8x2x128xf32, #tpu.memory_space<vmem>>, vector<8x1x128xf32>,
    %c0_42 = arith.constant 0 : index
    %c0_43 = arith.constant 0 : index
    %c0_44 = arith.constant 0 : index
    %53 = vector.load %arg15[%c0_42, %c0_43, %c0_44] : memref<2x8x16xf32, #tpu.memory_space<vmem>>, vector<1x8x16xf32>
    %54 = vector.shape_cast %53 : vector<1x8x16xf32> to vector<8x16xf32>
    %55 = vector.shape_cast %54 : vector<8x16xf32> to vector<8x1x16xf32>
    %c0_45 = arith.constant 0 : index
    %c0_46 = arith.constant 0 : index
    %c0_47 = arith.constant 0 : index
    %56 = vector.load %arg12[%c0_45, %c0_46, %c0_47] : memref<8x2x16xf32, #tpu.memory_space<vmem>>, vector<8x1x16xf32>
    tpu.vector_store %arg12[%c0_45, %c0_46, %c0_47], %55 {strides = array<i32>} : memref<8x2x16xf32, #tpu.memory_space<vmem>>, vector<8x1x16xf32>,
    %57 = vector.extract_strided_slice %48 {offsets = [1, 0, 0], sizes = [1, 8, 128], strides = [1, 1, 1]} : vector<2x8x128xf32> to vector<1x8x128xf32>
    %58 = vector.shape_cast %57 : vector<1x8x128xf32> to vector<8x128xf32>
    %59 = vector.shape_cast %58 : vector<8x128xf32> to vector<8x1x128xf32>
    %c0_48 = arith.constant 0 : index
    %c1 = arith.constant 1 : index
    %c0_49 = arith.constant 0 : index
    %60 = vector.load %arg11[%c0_48, %c1, %c0_49] : memref<8x2x128xf32, #tpu.memory_space<vmem>>, vector<8x1x128xf32>
    tpu.vector_store %arg11[%c0_48, %c1, %c0_49], %59 {strides = array<i32>} : memref<8x2x128xf32, #tpu.memory_space<vmem>>, vector<8x1x128xf32>,
    %c1_50 = arith.constant 1 : index
    %c0_51 = arith.constant 0 : index
    %c0_52 = arith.constant 0 : index
    %61 = vector.load %arg15[%c1_50, %c0_51, %c0_52] : memref<2x8x16xf32, #tpu.memory_space<vmem>>, vector<1x8x16xf32>
    %62 = vector.shape_cast %61 : vector<1x8x16xf32> to vector<8x16xf32>
    %63 = vector.shape_cast %62 : vector<8x16xf32> to vector<8x1x16xf32>
    %c0_53 = arith.constant 0 : index
    %c1_54 = arith.constant 1 : index
    %c0_55 = arith.constant 0 : index
    %64 = vector.load %arg12[%c0_53, %c1_54, %c0_55] : memref<8x2x16xf32, #tpu.memory_space<vmem>>, vector<8x1x16xf32>
    tpu.vector_store %arg12[%c0_53, %c1_54, %c0_55], %63 {strides = array<i32>} : memref<8x2x16xf32, #tpu.memory_space<vmem>>, vector<8x1x16xf32>,
    return
  }
  func.func @transform_0(%arg0: i32, %arg1: i32) -> (i32, i32, i32) {
    %c0_i32 = arith.constant 0 : i32
    %c0_i32_0 = arith.constant 0 : i32
    return %arg0, %arg1, %c0_i32 : i32, i32, i32
  }
  func.func @transform_1(%arg0: i32, %arg1: i32) -> (i32, i32, i32) {
    %c0_i32 = arith.constant 0 : i32
    %c0_i32_0 = arith.constant 0 : i32
    %c0_i32_1 = arith.constant 0 : i32
    return %arg0, %c0_i32, %c0_i32_0 : i32, i32, i32
  }
  func.func @transform_2(%arg0: i32, %arg1: i32) -> (i32, i32) {
    %c0_i32 = arith.constant 0 : i32
    %c0_i32_0 = arith.constant 0 : i32
    %c0_i32_1 = arith.constant 0 : i32
    return %c0_i32, %c0_i32_0 : i32, i32
  }
  func.func @transform_3(%arg0: i32, %arg1: i32) -> (i32, i32) {
    %c0_i32 = arith.constant 0 : i32
    %c0_i32_0 = arith.constant 0 : i32
    %c0_i32_1 = arith.constant 0 : i32
    return %c0_i32, %c0_i32_0 : i32, i32
  }
  func.func @transform_4(%arg0: i32, %arg1: i32) -> (i32, i32) {
    %c0_i32 = arith.constant 0 : i32
    %c0_i32_0 = arith.constant 0 : i32
    %c0_i32_1 = arith.constant 0 : i32
    return %c0_i32, %c0_i32_0 : i32, i32
  }
  func.func @transform_5(%arg0: i32, %arg1: i32) -> (i32, i32) {
    %c0_i32 = arith.constant 0 : i32
    %c0_i32_0 = arith.constant 0 : i32
    %c0_i32_1 = arith.constant 0 : i32
    return %c0_i32, %c0_i32_0 : i32, i32
  }
  func.func @transform_6(%arg0: i32, %arg1: i32) -> (i32, i32) {
    %c0_i32 = arith.constant 0 : i32
    %c0_i32_0 = arith.constant 0 : i32
    %c0_i32_1 = arith.constant 0 : i32
    return %c0_i32, %c0_i32_0 : i32, i32
  }
  func.func @transform_7(%arg0: i32, %arg1: i32) -> (i32, i32) {
    %c0_i32 = arith.constant 0 : i32
    %c0_i32_0 = arith.constant 0 : i32
    %c0_i32_1 = arith.constant 0 : i32
    return %c0_i32, %c0_i32_0 : i32, i32
  }
  func.func @transform_8(%arg0: i32, %arg1: i32) -> (i32, i32) {
    %c0_i32 = arith.constant 0 : i32
    %c0_i32_0 = arith.constant 0 : i32
    %c0_i32_1 = arith.constant 0 : i32
    return %c0_i32, %c0_i32_0 : i32, i32
  }
  func.func @transform_9(%arg0: i32, %arg1: i32) -> (i32, i32, i32) {
    %c0_i32 = arith.constant 0 : i32
    %c0_i32_0 = arith.constant 0 : i32
    return %arg1, %arg0, %c0_i32 : i32, i32, i32
  }
  func.func @transform_10(%arg0: i32, %arg1: i32) -> (i32, i32, i32) {
    %c0_i32 = arith.constant 0 : i32
    %c0_i32_0 = arith.constant 0 : i32
    return %arg1, %arg0, %c0_i32 : i32, i32, i32
  }
}

</mosaic_0001>

<bundles_post_ra>
// kernel: tpu_custom_call.1
= control target key start
LH: loop header
LB: loop body
LE: loop exit
PB: predicated region body
PF: predicated region fallthrough
CT: control target
= control target key end

     0   :  { %16 = vsyncpa [#allocation6], 0  ;;  %s4177_s0 = inlined_call_operand.hbm [shape: f32[2,8,128], index: 0, kind: input, shape index: {}]   ;;  %s4178_s1 = inlined_call_operand.hbm [shape: f32[2,16,128], index: 1, kind: input, shape index: {}]   ;;  %s4179_s2 = inlined_call_operand.hbm [shape: f32[128,128], index: 2, kind: input, shape index: {}]   ;;  %s4180_s3 = inlined_call_operand.vmem [shape: f32[1,128], index: 3, kind: input, shape index: {}]   ;;  %s4181_s4 = inlined_call_operand.hbm [shape: f32[128,128], index: 4, kind: input, shape index: {}]   ;;  %s4182_s5 = inlined_call_operand.vmem [shape: f32[1,128], index: 5, kind: input, shape index: {}]   ;;  %s4183_s6 = inlined_call_operand.hbm [shape: f32[128,128], index: 6, kind: input, shape index: {}]   ;;  %s4184_s7 = inlined_call_operand.hbm [shape: f32[128,128], index: 7, kind: input, shape index: {}]   ;;  %s4185_s8 = inlined_call_operand.vmem [shape: f32[1,128], index: 8, kind: input, shape index: {}]   ;;  %s4186_s9 = inlined_call_operand.hbm [shape: f32[8,2,128], index: 9, kind: output, shape index: {0}]   ;;  %s4187_s10 = inlined_call_operand.hbm [shape: f32[8,2,16], index: 10, kind: output, shape index: {1}]  }
   0x1   :  { %17 = vsyncpa [#allocation9], 0 }
   0x2   :  { %18 = vsyncpa [#allocation12], 0 }
   0x3   :  { %19 = vsyncpa [#allocation15], 0 }
   0x4   :  { %20 = vsyncpa [#allocation7], 0 }
   0x5   :  { %21 = vsyncpa [#allocation18], 0  ;;  %s3150_s13 = smov [#allocation8]   ;;  %s3151_s15 = smov [#allocation11]  }
   0x6   :  { %s39_s14 = sshll.u32 %s3150_s13, 4  ;;  %s65_s16 = sshll.u32 %s3151_s15, 4  ;;  %s40_s14 = int_to_ptr.vmem [resolvable:$true] %s39_s14  ;;  %s3222_s16 = int_to_ptr.vmem [resolvable:$true] %s65_s16 }
   0x7   :  { %s2962_s19 = scalar_lea.hbm %s4178_s1, 512 }
   0x8   :  { %p2963_p0 = scmp.ne.s32.totalorder %s4178_s1, %s2962_s19  ;;  %p2966_p1 = scmp.lt.u32.totalorder %s2962_s19, %s4178_s1 }
   0xa   :  { %p2968_p2 = pnand %p2966_p1, %p2963_p0 }
   0xc   :  { %2971 = shalt.err (!%p2968_p2)
}
   0xd   :  { %s2972_s24 = scalar_lea.vmem %s40_s14, 512  ;;  %p2977_p4 = scmp.lt.s32.totalorder %s40_s14, %s40_s14 }
   0xe   :  { %p2973_p3 = scmp.ne.s32.totalorder %s40_s14, %s2972_s24  ;;  %p2978_p5 = scmp.lt.s32.totalorder %s2972_s24, %s2972_s24 }
  0x10   :  { %p2979_p6 = por %p2978_p5, %p2977_p4 }
  0x12   :  { %p2980_p7 = pnand %p2979_p6, %p2973_p3 }
  0x14   :  { %2983 = shalt.err (!%p2980_p7)
}
  0x15   :  { %s3152_s25 = smov 128   ;;  %s3153_s26 = smov 8  }
  0x16   :  { %45 = dma.hbm_to_vmem [thread:$0]  %s4178_s1, 512, %s40_s14, [#allocation9], %s3152_s25, %s3152_s25, %s3153_s26  }
  0x17   :  { %s2984_s11 = scalar_lea.hbm %s4181_s4, 2048 }
  0x18   :  { %p2985_p8 = scmp.ne.s32.totalorder %s4181_s4, %s2984_s11  ;;  %p2988_p9 = scmp.lt.u32.totalorder %s2984_s11, %s4181_s4 }
  0x1a   :  { %p2990_p10 = pnand %p2988_p9, %p2985_p8 }
  0x1c   :  { %2993 = shalt.err (!%p2990_p10)
}
  0x1d   :  { %s2994_s18 = scalar_lea.vmem %s3222_s16, 2048  ;;  %p2999_p12 = scmp.lt.s32.totalorder %s3222_s16, %s3222_s16 }
  0x1e   :  { %p2995_p11 = scmp.ne.s32.totalorder %s3222_s16, %s2994_s18  ;;  %p3000_p13 = scmp.lt.s32.totalorder %s2994_s18, %s2994_s18 }
  0x20   :  { %p3001_p0 = por %p3000_p13, %p2999_p12 }
  0x22   :  { %p3002_p1 = pnand %p3001_p0, %p2995_p11 }
  0x24   :  { %3005 = shalt.err (!%p3002_p1)
}
  0x25   :  { %71 = dma.hbm_to_vmem [thread:$0]  %s4181_s4, 2048, %s3222_s16, [#allocation12], %s3152_s25, %s3152_s25, %s3153_s26  }
  0x26   :  { %s3154_s19 = smov [#allocation5]   ;;  %s3155_s21 = smov [#allocation10]  }
  0x27   :  { %s27_s20 = sshll.u32 %s3154_s19, 4  ;;  %s51_s22 = sshll.u32 %s3155_s21, 4  ;;  %s28_s20 = int_to_ptr.vmem [resolvable:$true] %s27_s20  ;;  %s3259_s22 = int_to_ptr.vmem [resolvable:$true] %s51_s22 }
  0x28   :  { %s3006_s27 = scalar_lea.hbm %s4177_s0, 256 }
  0x29   :  { %p3007_p2 = scmp.ne.s32.totalorder %s4177_s0, %s3006_s27  ;;  %p3010_p3 = scmp.lt.u32.totalorder %s3006_s27, %s4177_s0 }
  0x2b   :  { %p3012_p4 = pnand %p3010_p3, %p3007_p2 }
  0x2d   :  { %3015 = shalt.err (!%p3012_p4)
}
  0x2e   :  { %s3016_s4 = scalar_lea.vmem %s28_s20, 256  ;;  %p3021_p6 = scmp.lt.s32.totalorder %s28_s20, %s28_s20 }
  0x2f   :  { %p3017_p5 = scmp.ne.s32.totalorder %s28_s20, %s3016_s4  ;;  %p3022_p7 = scmp.lt.s32.totalorder %s3016_s4, %s3016_s4 }
  0x31   :  { %p3023_p8 = por %p3022_p7, %p3021_p6 }
  0x33   :  { %p3024_p9 = pnand %p3023_p8, %p3017_p5 }
  0x35   :  { %3027 = shalt.err (!%p3024_p9)
}
  0x36   :  { %33 = dma.hbm_to_vmem [thread:$0]  %s4177_s0, 256, %s28_s20, [#allocation6], %s3152_s25, %s3152_s25, %s3153_s26  }
  0x37   :  { %s3028_s17 = scalar_lea.hbm %s4179_s2, 2048 }
  0x38   :  { %p3029_p10 = scmp.ne.s32.totalorder %s4179_s2, %s3028_s17  ;;  %p3032_p11 = scmp.lt.u32.totalorder %s3028_s17, %s4179_s2 }
  0x3a   :  { %p3034_p12 = pnand %p3032_p11, %p3029_p10 }
  0x3c   :  { %3037 = shalt.err (!%p3034_p12)
}
  0x3d   :  { %s3038_s21 = scalar_lea.vmem %s3259_s22, 2048  ;;  %p3043_p0 = scmp.lt.s32.totalorder %s3259_s22, %s3259_s22 }
  0x3e   :  { %p3039_p13 = scmp.ne.s32.totalorder %s3259_s22, %s3038_s21  ;;  %p3044_p1 = scmp.lt.s32.totalorder %s3038_s21, %s3038_s21 }
  0x40   :  { %p3045_p2 = por %p3044_p1, %p3043_p0 }
  0x42   :  { %p3046_p3 = pnand %p3045_p2, %p3039_p13 }
  0x44   :  { %3049 = shalt.err (!%p3046_p3)
}
  0x45   :  { %57 = dma.hbm_to_vmem [thread:$0]  %s4179_s2, 2048, %s3259_s22, [#allocation9], %s3152_s25, %s3152_s25, %s3153_s26  }
  0x46   :  { %s3156_s23 = smov [#allocation13]   ;;  %s3157_s27 = smov [#allocation14]  }
  0x47   :  { %s79_s24 = sshll.u32 %s3156_s23, 4  ;;  %s91_s28 = sshll.u32 %s3157_s27, 4  ;;  %s80_s24 = int_to_ptr.vmem [resolvable:$true] %s79_s24  ;;  %s3296_s28 = int_to_ptr.vmem [resolvable:$true] %s91_s28 }
  0x48   :  { %s3050_s11 = scalar_lea.hbm %s4183_s6, 2048 }
  0x49   :  { %p3051_p4 = scmp.ne.s32.totalorder %s4183_s6, %s3050_s11  ;;  %p3054_p5 = scmp.lt.u32.totalorder %s3050_s11, %s4183_s6 }
  0x4b   :  { %p3056_p6 = pnand %p3054_p5, %p3051_p4 }
  0x4d   :  { %3059 = shalt.err (!%p3056_p6)
}
  0x4e   :  { %s3060_s2 = scalar_lea.vmem %s80_s24, 2048  ;;  %p3065_p8 = scmp.lt.s32.totalorder %s80_s24, %s80_s24 }
  0x4f   :  { %p3061_p7 = scmp.ne.s32.totalorder %s80_s24, %s3060_s2  ;;  %p3066_p9 = scmp.lt.s32.totalorder %s3060_s2, %s3060_s2 }
  0x51   :  { %p3067_p10 = por %p3066_p9, %p3065_p8 }
  0x53   :  { %p3068_p11 = pnand %p3067_p10, %p3061_p7 }
  0x55   :  { %3071 = shalt.err (!%p3068_p11)
}
  0x56   :  { %85 = dma.hbm_to_vmem [thread:$0]  %s4183_s6, 2048, %s80_s24, [#allocation12], %s3152_s25, %s3152_s25, %s3153_s26  }
  0x57   :  { %s3072_s1 = scalar_lea.hbm %s4184_s7, 2048 }
  0x58   :  { %p3073_p12 = scmp.ne.s32.totalorder %s4184_s7, %s3072_s1  ;;  %p3076_p13 = scmp.lt.u32.totalorder %s3072_s1, %s4184_s7 }
  0x5a   :  { %p3078_p0 = pnand %p3076_p13, %p3073_p12 }
  0x5c   :  { %3081 = shalt.err (!%p3078_p0)
}
  0x5d   :  { %s3082_s20 = scalar_lea.vmem %s3296_s28, 2048  ;;  %p3087_p2 = scmp.lt.s32.totalorder %s3296_s28, %s3296_s28 }
  0x5e   :  { %p3083_p1 = scmp.ne.s32.totalorder %s3296_s28, %s3082_s20  ;;  %p3088_p3 = scmp.lt.s32.totalorder %s3082_s20, %s3082_s20 }
  0x60   :  { %p3089_p4 = por %p3088_p3, %p3087_p2 }
  0x62   :  { %p3090_p5 = pnand %p3089_p4, %p3083_p1 }
  0x64   :  { %3093 = shalt.err (!%p3090_p5)
}
  0x65   :  { %97 = dma.hbm_to_vmem [thread:$0]  %s4184_s7, 2048, %s3296_s28, [#allocation15], %s3152_s25, %s3152_s25, %s3153_s26  }
  0x66   :  { %3138 = dma.done.wait [#allocation6], 256  }
  0x67   :  { %3139 = vsyncadd [#allocation6], 4294967040 }
  0x68   :  { %3140 = dma.done.wait [#allocation9], 2560  }
  0x69   :  { %3141 = vsyncadd [#allocation9], 4294964736 }
  0x6a   :  { %3142 = dma.done.wait [#allocation12], 4096  }
  0x6b   :  { %3143 = vsyncadd [#allocation12], 4294963200 }
  0x6c   :  { %3144 = dma.done.wait [#allocation15], 2048  }
  0x6d   :  { %3145 = vsyncadd [#allocation15], 4294965248  ;;  %v126_v0 = vld [vmem:[#allocation11] sm:$0xff]  ;;  %v127_v1 = vld [vmem:[#allocation11 + $0x8] sm:$0xff]  ;;  %v3158_v58 = vmov 1966171168   ;;  %v346_v60 = vlaneseq }
  0x6e   :  { %v128_v2 = vld [vmem:[#allocation11 + $0x10] sm:$0xff]  ;;  %v2671_v3 = vpack.c.bf16 %v127_v1, %v126_v0  ;;  %v129_v4 = vld [vmem:[#allocation11 + $0x18] sm:$0xff]  ;;  %v130_v6 = vld [vmem:[#allocation11 + $0x20] sm:$0xff]  ;;  %v344_v59 = vunpack.c.l.s4 %v3158_v58  ;;  %vm729_vm0 = vcmask 130112   ;;  %vm866_vm1 = vcmask 1041409  }
  0x6f   :  { %v2675_v5 = vpack.c.bf16 %v129_v4, %v128_v2  ;;  %v131_v7 = vld [vmem:[#allocation11 + $0x28] sm:$0xff]  ;;  %v122_v9 = vld [vmem:[#allocation8] sm:$0xff]  ;;  %v132_v10 = vld [vmem:[#allocation11 + $0x30] sm:$0xff]  ;;  %v3342_v62 = vshrl.u32 %v346_v60, 7  ;;  %vm868_vm2 = vcmask 1042434   ;;  %vm870_vm3 = vcmask 1043459  }
  0x70   :  { %2672 = vmatprep.subr.bf16.mxu0 %v2671_v3  ;;  %v2679_v8 = vpack.c.bf16 %v131_v7, %v130_v6  ;;  %v133_v11 = vld [vmem:[#allocation11 + $0x38] sm:$0xff]  ;;  %2546 = vmatprep.mubr.f32.mxu0 %v122_v9  ;;  %v134_v13 = vld [vmem:[#allocation11 + $0x40] sm:$0xff]  ;;  %v135_v14 = vld [vmem:[#allocation11 + $0x48] sm:$0xff]  ;;  %v345_v61 = vunpack.c.0.s8 %v344_v59  ;;  %vm872_vm4 = vcmask 1044484   ;;  %vm874_vm5 = vcmask 1045509  }
  0x71   :  { %2674 = vmatpush3.bf16.msra.mxu0 %v2671_v3  ;;  %v2683_v12 = vpack.c.bf16 %v133_v11, %v132_v10  ;;  %v2687_v15 = vpack.c.bf16 %v135_v14, %v134_v13  ;;  %v136_v16 = vld [vmem:[#allocation11 + $0x50] sm:$0xff]  ;;  %v137_v17 = vld [vmem:[#allocation11 + $0x58] sm:$0xff]  ;;  %v138_v19 = vld [vmem:[#allocation11 + $0x60] sm:$0xff]  ;;  %v3352_v7 = vsub.s32 0, %v3342_v62  ;;  %vm876_vm6 = vcmask 1046534  }
  0x72   :  { %2676 = vmatprep.subr.bf16.mxu0 %v2675_v5  ;;  %v2691_v18 = vpack.c.bf16 %v137_v17, %v136_v16  ;;  %v139_v20 = vld [vmem:[#allocation11 + $0x68] sm:$0xff]  ;;  %v140_v22 = vld [vmem:[#allocation11 + $0x70] sm:$0xff]  ;;  %v141_v23 = vld [vmem:[#allocation11 + $0x78] sm:$0xff]  ;;  %v3348_v0 = vsub.s32 %v345_v61, %v3342_v62  ;;  %vm878_vm7 = vcmask 1047559   ;;  %vm889_vm8 = vcmask 130048  }
  0x73   :  { %v2695_v21 = vpack.c.bf16 %v139_v20, %v138_v19  ;;  %v2699_v24 = vpack.c.bf16 %v141_v23, %v140_v22  ;;  %v233_v25 = vld [vmem:[#allocation10] sm:$0xff]  ;;  %v234_v26 = vld [vmem:[#allocation10 + $0x8] sm:$0xff]  ;;  %v235_v28 = vld [vmem:[#allocation10 + $0x10] sm:$0xff]  ;;  %vm3161_vm9 = vmmov 0   ;;  %vm2242_vm10 = vcmask 122880  }
  0x74   :  { %v2703_v27 = vpack.c.bf16 %v234_v26, %v233_v25  ;;  %v236_v29 = vld [vmem:[#allocation10 + $0x18] sm:$0xff]  ;;  %v123_v30 = vld [vmem:[#allocation8 + $0x8] sm:$0xff]  ;;  %v124_v32 = vld [vmem:[#allocation8 + $0x10] sm:$0xff]  ;;  %4206 = vst [vmem:[#allocation25_spill] sm:$0xff] %v3348_v0 }
  0x75   :  { %2678 = vmatpush3.bf16.msra.mxu0 %v2675_v5  ;;  %v2707_v31 = vpack.c.bf16 %v236_v29, %v235_v28  ;;  %v237_v33 = vld [vmem:[#allocation10 + $0x20] sm:$0xff]  ;;  %v238_v34 = vld [vmem:[#allocation10 + $0x28] sm:$0xff]  ;;  %v125_v35 = vld [vmem:[#allocation8 + $0x18] sm:$0xff] }
  0x76   :  { %2680 = vmatprep.subr.bf16.mxu0 %v2679_v8  ;;  %v2711_v36 = vpack.c.bf16 %v238_v34, %v237_v33  ;;  %v231_v37 = vld [vmem:[#allocation5] sm:$0xff]  ;;  %v240_v39 = vld [vmem:[#allocation10 + $0x38] sm:$0xff]  ;;  %v241_v41 = vld [vmem:[#allocation10 + $0x40] sm:$0xff] }
  0x77   :  { %v239_v38 = vld [vmem:[#allocation10 + $0x30] sm:$0xff]  ;;  %v242_v42 = vld [vmem:[#allocation10 + $0x48] sm:$0xff]  ;;  %v244_v45 = vld [vmem:[#allocation10 + $0x58] sm:$0xff] }
  0x78   :  { %v2715_v40 = vpack.c.bf16 %v240_v39, %v239_v38  ;;  %v2719_v43 = vpack.c.bf16 %v242_v42, %v241_v41  ;;  %v243_v44 = vld [vmem:[#allocation10 + $0x50] sm:$0xff]  ;;  %v245_v47 = vld [vmem:[#allocation10 + $0x60] sm:$0xff]  ;;  %v246_v48 = vld [vmem:[#allocation10 + $0x68] sm:$0xff] }
  0x79   :  { %2682 = vmatpush3.bf16.msra.mxu0 %v2679_v8  ;;  %v2723_v46 = vpack.c.bf16 %v244_v45, %v243_v44  ;;  %v2727_v49 = vpack.c.bf16 %v246_v48, %v245_v47  ;;  %v247_v50 = vld [vmem:[#allocation10 + $0x70] sm:$0xff]  ;;  %v248_v51 = vld [vmem:[#allocation10 + $0x78] sm:$0xff]  ;;  %v2421_v63 = vld [vmem:[%s4180_s3] ss:$0 sm:$0xff] }
  0x7a   :  { %2684 = vmatprep.subr.bf16.mxu0 %v2683_v12  ;;  %v2731_v52 = vpack.c.bf16 %v248_v51, %v247_v50  ;;  %v232_v53 = vld [vmem:[#allocation5 + $0x8] sm:$0xff] }
  0x7d   :  { %2686 = vmatpush3.bf16.msra.mxu0 %v2683_v12 }
  0x7e   :  { %2688 = vmatprep.subr.bf16.mxu0 %v2687_v15 }
  0x81   :  { %2690 = vmatpush3.bf16.msra.mxu0 %v2687_v15 }
  0x82   :  { %2692 = vmatprep.subr.bf16.mxu0 %v2691_v18 }
  0x85   :  { %2694 = vmatpush3.bf16.msra.mxu0 %v2691_v18 }
  0x86   :  { %2696 = vmatprep.subr.bf16.mxu0 %v2695_v21 }
  0x89   :  { %2698 = vmatpush3.bf16.msra.mxu0 %v2695_v21 }
  0x8a   :  { %2700 = vmatprep.subr.bf16.mxu0 %v2699_v24 }
  0x8d   :  { %2702 = vmatpush3.bf16.msra.mxu0 %v2699_v24 }
  0x8e   :  { %2704 = vmatprep.subr.bf16.mxu0 %v2703_v27 }
  0x90   :  { %2547 = vmatmul.mubr.f32.vlgmr.msra.gmra.mrb[0].mxu0 %v123_v30 }
  0x91   :  { %2706 = vmatpush3.bf16.msra.mxu0 %v2703_v27  ;;  %2549 = vmatprep.mubr.f32.mxu0 %v124_v32 }
  0x92   :  { %2708 = vmatprep.subr.bf16.mxu0 %v2707_v31 }
  0x94   :  { %2550 = vmatmul.mubr.f32.gmra.mrb[2].mxu0 %v125_v35 }
  0x95   :  { %2710 = vmatpush3.bf16.msra.mxu0 %v2707_v31  ;;  %2584 = vmatprep.mubr.f32.mxu0 %v231_v37 }
  0x96   :  { %2712 = vmatprep.subr.bf16.mxu0 %v2711_v36 }
  0x99   :  { %2714 = vmatpush3.bf16.msra.mxu0 %v2711_v36 }
  0x9a   :  { %2716 = vmatprep.subr.bf16.mxu0 %v2715_v40 }
  0x9d   :  { %2718 = vmatpush3.bf16.msra.mxu0 %v2715_v40 }
  0x9e   :  { %2720 = vmatprep.subr.bf16.mxu0 %v2719_v43 }
  0xa1   :  { %2722 = vmatpush3.bf16.msra.mxu0 %v2719_v43 }
  0xa2   :  { %2724 = vmatprep.subr.bf16.mxu0 %v2723_v46 }
  0xa5   :  { %2726 = vmatpush3.bf16.msra.mxu0 %v2723_v46 }
  0xa6   :  { %2728 = vmatprep.subr.bf16.mxu0 %v2727_v49 }
  0xa9   :  { %2730 = vmatpush3.bf16.msra.mxu0 %v2727_v49 }
  0xaa   :  { %2732 = vmatprep.subr.bf16.mxu0 %v2731_v52 }
  0xad   :  { %2734 = vmatpush3.bf16.msra.mxu0 %v2731_v52 }
  0xb0   :  { %2585 = vmatmul.mubr.f32.vlgmr.msra.gmra.mrb[4].mxu0 %v232_v53 }
 0x163   :  { %v3333_v54 = vpop.f32.mrb[0].mxu0 }
 0x164   :  { %v3335_v55 = vpop.f32.mrb[1].mxu0 }
 0x167   :  { %v3337_v56 = vpop.f32.mrb[2].mxu0 }
 0x168   :  { %v3339_v57 = vpop.f32.mrb[3].mxu0 }
 0x183   :  { %v2586_v1 = vpop.f32.mrb[4].mxu0 }
 0x184   :  { %v328_v2 = vadd.f32 %v2586_v1, %v2421_v63  ;;  %v322_v3 = vpop.f32.mrb[5].mxu0 }
 0x185   :  { %v323_v4 = vadd.f32 %v2421_v63, %v322_v3 }
 0x186   :  { %v391_v5 = vcombine.high %v328_v2, %v328_v2  ;;  %v398_v6 = vrot.slane %v328_v2, %v3348_v0 }
 0x187   :  { %v342_v8 = vcombine.high %v323_v4, %v323_v4  ;;  %v349_v9 = vrot.slane %v323_v4, %v3348_v0 }
 0x188   :  { %v405_v10 = vrot.slane %v391_v5, %v3348_v0  ;;  %v406_v11 = vcombine.high %v398_v6, %v398_v6  ;;  %v414_v12 = vrot.slane %v398_v6, %v3348_v0 }
 0x189   :  { %v356_v13 = vrot.slane %v342_v8, %v3348_v0  ;;  %v357_v14 = vcombine.high %v349_v9, %v349_v9  ;;  %v365_v21 = vrot.slane %v349_v9, %v3348_v0 }
 0x18a   :  { %v407_v15 = vcombine.high %v405_v10, %v405_v10  ;;  %v421_v16 = vrot.slane %v405_v10, %v3348_v0  ;;  %v428_v17 = vrot.slane %v406_v11, %v3348_v0  ;;  %v436_v18 = vcombine.high %v414_v12, %v414_v12 }
 0x18b   :  { %v475_v19 = vrot.slane %v414_v12, %v3352_v7  ;;  %v358_v20 = vcombine.high %v356_v13, %v356_v13  ;;  %v372_v22 = vrot.slane %v356_v13, %v3348_v0  ;;  %v379_v34 = vrot.slane %v357_v14, %v3348_v0 }
 0x18c   :  { %v435_v23 = vrot.slane %v407_v15, %v3348_v0  ;;  %v437_v24 = vcombine.high %v421_v16, %v421_v16  ;;  %v438_v25 = vcombine.high %v428_v17, %v428_v17  ;;  %v479_v26 = vrot.slane %v428_v17, %v3352_v7 }
 0x18d   :  { %v483_v27 = vrot.slane %v436_v18, %v3352_v7  ;;  %v491_v28 = vrot.slane %v421_v16, %v3352_v7  ;;  %v536_v29 = vadd.f32 %v475_v19, %v3339_v57  ;;  %v537_v30 = vadd.f32 %v3337_v56, %v475_v19 }
 0x18e   :  { %v487_v31 = vrot.slane %v438_v25, %v3352_v7  ;;  %v495_v32 = vrot.slane %v435_v23, %v3352_v7  ;;  %v499_v33 = vrot.slane %v437_v24, %v3352_v7  ;;  %v538_v35 = vadd.f32 %v479_v26, %v3339_v57 }
 0x18f   :  { %v539_v36 = vadd.f32 %v3337_v56, %v479_v26  ;;  %v540_v37 = vadd.f32 %v483_v27, %v3339_v57  ;;  %v541_v38 = vadd.f32 %v3337_v56, %v483_v27  ;;  %v439_v39 = vcombine.high %v435_v23, %v435_v23 }
 0x190   :  { %v3378_v40 = vadd.f32 %v487_v31, %v3339_v57  ;;  %v3381_v41 = vadd.f32 %v3337_v56, %v487_v31  ;;  %v3384_v42 = vadd.f32 %v491_v28, %v3339_v57  ;;  %v545_v43 = vadd.f32 %v3337_v56, %v491_v28 }
 0x191   :  { %v3388_v44 = vadd.f32 %v495_v32, %v3339_v57  ;;  %v3391_v45 = vadd.f32 %v3337_v56, %v495_v32  ;;  %v3394_v46 = vadd.f32 %v499_v33, %v3339_v57  ;;  %v3397_v47 = vadd.f32 %v3337_v56, %v499_v33 }
 0x192   :  { %2828 = vtanh.f32 %v536_v29  ;;  %v386_v48 = vrot.slane %v358_v20, %v3348_v0  ;;  %v387_v49 = vcombine.high %v365_v21, %v365_v21  ;;  %v388_v50 = vcombine.high %v372_v22, %v372_v22  ;;  %v3438_v20 = vld [vmem:[%s4182_s5] ss:$0 sm:$0xff]  ;;  %s3163_s5 = smov [#allocation17]  }
 0x193   :  { %2830 = vtanh.f32 %v537_v30  ;;  %v389_v51 = vcombine.high %v379_v34, %v379_v34  ;;  %v443_v52 = vrot.slane %v365_v21, %v3352_v7  ;;  %v447_v58 = vrot.slane %v379_v34, %v3352_v7  ;;  %s2402_s24 = sshll.u32 %s3163_s5, 4  ;;  %s2403_s24 = int_to_ptr.vmem [resolvable:$true] %s2402_s24 }
 0x194   :  { %v390_v53 = vcombine.high %v386_v48, %v386_v48  ;;  %v451_v59 = vrot.slane %v387_v49, %v3352_v7  ;;  %2832 = vtanh.f32 %v539_v36  ;;  %v459_v63 = vrot.slane %v372_v22, %v3352_v7  ;;  %s3094_s27 = scalar_lea.vmem %s2403_s24, 256  ;;  %p3099_p7 = scmp.lt.s32.totalorder %s2403_s24, %s2403_s24 }
 0x195   :  { %v455_v61 = vrot.slane %v389_v51, %v3352_v7  ;;  %v503_v1 = vrot.slane %v439_v39, %v3352_v7  ;;  %v463_v2 = vrot.slane %v386_v48, %v3352_v7  ;;  %v467_v3 = vrot.slane %v388_v50, %v3352_v7  ;;  %p3095_p6 = scmp.ne.s32.totalorder %s2403_s24, %s3094_s27  ;;  %p3100_p8 = scmp.lt.s32.totalorder %s3094_s27, %s3094_s27 }
 0x196   :  { %v520_v4 = vadd.f32 %v443_v52, %v3335_v55  ;;  %v471_v5 = vrot.slane %v390_v53, %v3352_v7  ;;  %v521_v6 = vadd.f32 %v3333_v54, %v443_v52  ;;  %v522_v8 = vadd.f32 %v447_v58, %v3335_v55 }
 0x197   :  { %v523_v9 = vadd.f32 %v3333_v54, %v447_v58  ;;  %v524_v10 = vadd.f32 %v451_v59, %v3335_v55  ;;  %v525_v11 = vadd.f32 %v3333_v54, %v451_v59  ;;  %v3416_v12 = vadd.f32 %v455_v61, %v3335_v55  ;;  %p3101_p9 = por %p3100_p8, %p3099_p7 }
 0x198   :  { %2834 = vtanh.f32 %v541_v38  ;;  %v3419_v13 = vadd.f32 %v3333_v54, %v455_v61  ;;  %v528_v14 = vadd.f32 %v459_v63, %v3335_v55  ;;  %v529_v15 = vadd.f32 %v3333_v54, %v459_v63 }
 0x199   :  { %v3424_v16 = vadd.f32 %v463_v2, %v3335_v55  ;;  %v3427_v17 = vadd.f32 %v3333_v54, %v463_v2  ;;  %v3430_v18 = vadd.f32 %v467_v3, %v3335_v55  ;;  %v3433_v19 = vadd.f32 %v3333_v54, %v467_v3  ;;  %p3102_p10 = pnand %p3101_p9, %p3095_p6 }
 0x19a   :  { %2836 = vtanh.f32 %v520_v4  ;;  %v3441_v21 = vadd.f32 %v3333_v54, %v471_v5  ;;  %v3444_v22 = vadd.f32 %v471_v5, %v3335_v55  ;;  %v3447_v23 = vadd.f32 %v3337_v56, %v503_v1 }
 0x19b   :  { %2838 = vtanh.f32 %v545_v43  ;;  %v550_v25 = vadd.f32 %v503_v1, %v3339_v57 }
 0x19c   :  { %v2829_v24 = vpop.eup %2828  ;;  %2840 = vtanh.f32 %v521_v6 }
 0x19d   :  { %v2831_v26 = vpop.eup %2830  ;;  %v606_v27 = vmul.f32 %v2829_v24, %v3438_v20  ;;  %2842 = vtanh.f32 %v538_v35 }
 0x19e   :  { %v607_v28 = vmul.f32 %v2831_v26, %v3438_v20  ;;  %v2833_v29 = vpop.eup %2832  ;;  %2844 = vtanh.f32 %v522_v8 }
 0x19f   :  { %654 = vadd.xlane.f32.xlu0 %v606_v27  ;;  %v609_v54 = vmul.f32 %v2833_v29, %v3438_v20  ;;  %2846 = vtanh.f32 %v540_v37 }
 0x1a0   :  { %656 = vadd.xlane.f32.xlu1 %v607_v28  ;;  %2848 = vtanh.f32 %v523_v9 }
 0x1a1   :  { %2850 = vtanh.f32 %v3384_v42 }
 0x1a2   :  { %v2835_v55 = vpop.eup %2834  ;;  %2852 = vtanh.f32 %v525_v11 }
 0x1a3   :  { %v611_v31 = vmul.f32 %v2835_v55, %v3438_v20  ;;  %2854 = vtanh.f32 %v524_v10 }
 0x1a4   :  { %660 = vadd.xlane.f32.xlu1 %v609_v54  ;;  %v2837_v56 = vpop.eup %2836  ;;  %2856 = vtanh.f32 %v529_v15 }
 0x1a5   :  { %v2839_v30 = vpop.eup %2838  ;;  %v590_v57 = vmul.f32 %v2837_v56, %v3438_v20  ;;  %2858 = vtanh.f32 %v528_v14 }
 0x1a6   :  { %v2841_v32 = vpop.eup %2840  ;;  %v615_v35 = vmul.f32 %v2839_v30, %v3438_v20  ;;  %2860 = vtanh.f32 %v3381_v41 }
 0x1a7   :  { %622 = vadd.xlane.f32.xlu0 %v590_v57  ;;  %v2843_v33 = vpop.eup %2842  ;;  %v591_v34 = vmul.f32 %v2841_v32, %v3438_v20  ;;  %2862 = vtanh.f32 %v550_v25 }
 0x1a8   :  { %664 = vadd.xlane.f32.xlu1 %v611_v31  ;;  %v2845_v36 = vpop.eup %2844  ;;  %v608_v38 = vmul.f32 %v2843_v33, %v3438_v20  ;;  %2864 = vtanh.f32 %v3378_v40 }
 0x1a9   :  { %v2847_v37 = vpop.eup %2846  ;;  %v592_v39 = vmul.f32 %v2845_v36, %v3438_v20  ;;  %2866 = vtanh.f32 %v3391_v45 }
 0x1aa   :  { %v2849_v43 = vpop.eup %2848  ;;  %v610_v48 = vmul.f32 %v2847_v37, %v3438_v20  ;;  %2868 = vtanh.f32 %v3388_v44 }
 0x1ab   :  { %624 = vadd.xlane.f32.xlu0 %v591_v34  ;;  %v2851_v42 = vpop.eup %2850  ;;  %v593_v49 = vmul.f32 %v2849_v43, %v3438_v20  ;;  %2870 = vtanh.f32 %v3397_v47 }
 0x1ac   :  { %672 = vadd.xlane.f32.xlu1 %v615_v35  ;;  %v2853_v50 = vpop.eup %2852  ;;  %v614_v52 = vmul.f32 %v2851_v42, %v3438_v20  ;;  %2872 = vtanh.f32 %v3394_v46 }
 0x1ad   :  { %v2855_v51 = vpop.eup %2854  ;;  %v595_v53 = vmul.f32 %v2853_v50, %v3438_v20  ;;  %2874 = vtanh.f32 %v3419_v13  ;;  %v719_v50 = vand.u32 127, %v346_v60 }
 0x1ae   :  { %v2857_v58 = vpop.eup %2856  ;;  %v594_v59 = vmul.f32 %v2855_v51, %v3438_v20  ;;  %2876 = vtanh.f32 %v3416_v12 }
 0x1af   :  { %658 = vadd.xlane.f32.xlu0 %v608_v38  ;;  %v2859_v41 = vpop.eup %2858  ;;  %v599_v61 = vmul.f32 %v2857_v58, %v3438_v20  ;;  %2878 = vtanh.f32 %v3427_v17 }
 0x1b0   :  { %626 = vadd.xlane.f32.xlu1 %v592_v39  ;;  %v2861_v40 = vpop.eup %2860  ;;  %v598_v44 = vmul.f32 %v2859_v41, %v3438_v20  ;;  %2880 = vtanh.f32 %v3424_v16 }
 0x1b1   :  { %v2863_v63 = vpop.eup %2862  ;;  %v613_v47 = vmul.f32 %v2861_v40, %v3438_v20  ;;  %2882 = vtanh.f32 %v3433_v19 }
 0x1b2   :  { %v620_v45 = vmul.f32 %v2863_v63, %v3438_v20  ;;  %v2865_v1 = vpop.eup %2864  ;;  %2884 = vtanh.f32 %v3430_v18 }
 0x1b3   :  { %662 = vadd.xlane.f32.xlu0 %v610_v48  ;;  %v2867_v2 = vpop.eup %2866  ;;  %v612_v4 = vmul.f32 %v2865_v1, %v3438_v20  ;;  %2886 = vtanh.f32 %v3441_v21 }
 0x1b4   :  { %628 = vadd.xlane.f32.xlu1 %v593_v49  ;;  %v2869_v3 = vpop.eup %2868  ;;  %v617_v46 = vmul.f32 %v2867_v2, %v3438_v20  ;;  %2888 = vtanh.f32 %v3444_v22 }
 0x1b5   :  { %v2871_v5 = vpop.eup %2870  ;;  %v616_v8 = vmul.f32 %v2869_v3, %v3438_v20  ;;  %2890 = vtanh.f32 %v3447_v23 }
 0x1b6   :  { %v2873_v6 = vpop.eup %2872  ;;  %v619_v9 = vmul.f32 %v2871_v5, %v3438_v20 }
 0x1b7   :  { %670 = vadd.xlane.f32.xlu0 %v614_v52  ;;  %v2875_v10 = vpop.eup %2874  ;;  %v618_v12 = vmul.f32 %v2873_v6, %v3438_v20 }
 0x1b8   :  { %632 = vadd.xlane.f32.xlu1 %v595_v53  ;;  %v2877_v11 = vpop.eup %2876  ;;  %v597_v13 = vmul.f32 %v2875_v10, %v3438_v20  ;;  %v724_v53 = vadd.s32 4294967288, %v719_v50 }
 0x1b9   :  { %v2879_v14 = vpop.eup %2878  ;;  %v596_v16 = vmul.f32 %v2877_v11, %v3438_v20 }
 0x1ba   :  { %v2881_v15 = vpop.eup %2880  ;;  %v601_v17 = vmul.f32 %v2879_v14, %v3438_v20 }
 0x1bb   :  { %630 = vadd.xlane.f32.xlu0 %v594_v59  ;;  %v2883_v18 = vpop.eup %2882  ;;  %v600_v21 = vmul.f32 %v2881_v15, %v3438_v20  ;;  %v3546_v59 = vsub.s32 %v719_v50, %v3342_v62 }
 0x1bc   :  { %640 = vadd.xlane.f32.xlu1 %v599_v61  ;;  %v2885_v19 = vpop.eup %2884  ;;  %v603_v24 = vmul.f32 %v2883_v18, %v3438_v20  ;;  %v3549_v61 = vsub.s32 %v724_v53, %v3342_v62 }
 0x1bd   :  { %v2887_v25 = vpop.eup %2886  ;;  %v602_v22 = vmul.f32 %v2885_v19, %v3438_v20 }
 0x1be   :  { %v2889_v26 = vpop.eup %2888  ;;  %v605_v23 = vmul.f32 %v2887_v25, %v3438_v20 }
 0x1bf   :  { %638 = vadd.xlane.f32.xlu0 %v598_v44  ;;  %v2891_v27 = vpop.eup %2890  ;;  %v604_v28 = vmul.f32 %v2889_v26, %v3438_v20 }
 0x1c0   :  { %668 = vadd.xlane.f32.xlu1 %v613_v47  ;;  %v621_v29 = vmul.f32 %v2891_v27, %v3438_v20 }
 0x1c3   :  { %666 = vadd.xlane.f32.xlu0 %v612_v4 }
 0x1c4   :  { %676 = vadd.xlane.f32.xlu1 %v617_v46 }
 0x1c7   :  { %674 = vadd.xlane.f32.xlu0 %v616_v8 }
 0x1c8   :  { %680 = vadd.xlane.f32.xlu1 %v619_v9 }
 0x1cb   :  { %678 = vadd.xlane.f32.xlu0 %v618_v12 }
 0x1cc   :  { %636 = vadd.xlane.f32.xlu1 %v597_v13 }
 0x1cf   :  { %634 = vadd.xlane.f32.xlu0 %v596_v16 }
 0x1d0   :  { %644 = vadd.xlane.f32.xlu1 %v601_v17 }
 0x1d3   :  { %642 = vadd.xlane.f32.xlu0 %v600_v21 }
 0x1d4   :  { %648 = vadd.xlane.f32.xlu1 %v603_v24 }
 0x1d7   :  { %646 = vadd.xlane.f32.xlu0 %v602_v22 }
 0x1d8   :  { %652 = vadd.xlane.f32.xlu1 %v605_v23 }
 0x1db   :  { %650 = vadd.xlane.f32.xlu0 %v604_v28 }
 0x1dc   :  { %684 = vadd.xlane.f32.xlu1 %v621_v29 }
 0x1df   :  { %682 = vadd.xlane.f32.xlu0 %v620_v45 }
 0x22c   :  { %v3500_v55 = vpop.xlane.xlu0 %654 }
 0x22d   :  { %v3498_v54 = vpop.xlane.xlu1 %656  ;;  %v797_v45 = vrot.slane %v3500_v55, %v3546_v59 }
 0x22e   :  { %v801_v60 = vrot.slane %v3498_v54, %v3549_v61 }
 0x230   :  { %v802_v11 = vsel %vm729_vm0, %v801_v60, %v797_v45 }
 0x231   :  { %v3502_v56 = vpop.xlane.xlu1 %660 }
 0x232   :  { %v810_v8 = vrot.slane %v3502_v56, %v3549_v61 }
 0x234   :  { %v3504_v30 = vpop.xlane.xlu0 %622 }
 0x235   :  { %v3506_v57 = vpop.xlane.xlu1 %664  ;;  %v723_v4 = vrot.slane %v3504_v30, %v3546_v59 }
 0x236   :  { %v819_v12 = vrot.slane %v3506_v57, %v3549_v61 }
 0x238   :  { %v3508_v31 = vpop.xlane.xlu0 %624 }
 0x239   :  { %v3510_v32 = vpop.xlane.xlu1 %672  ;;  %v728_v1 = vrot.slane %v3508_v31, %v3549_v61 }
 0x23b   :  { %v730_v13 = vsel %vm729_vm0, %v728_v1, %v723_v4 }
 0x23c   :  { %v3512_v33 = vpop.xlane.xlu0 %658 }
 0x23d   :  { %v3514_v20 = vpop.xlane.xlu1 %626  ;;  %v806_v47 = vrot.slane %v3512_v33, %v3546_v59 }
 0x23e   :  { %v734_v46 = vrot.slane %v3514_v20, %v3546_v59 }
 0x23f   :  { %v811_v15 = vsel %vm729_vm0, %v810_v8, %v806_v47 }
 0x240   :  { %v3516_v34 = vpop.xlane.xlu0 %662  ;;  %v880_v50 = vsel %vm866_vm1, %v811_v15, %v802_v11 }
 0x241   :  { %v3518_v35 = vpop.xlane.xlu1 %628  ;;  %v815_v16 = vrot.slane %v3516_v34, %v3546_v59 }
 0x242   :  { %v738_v44 = vrot.slane %v3518_v35, %v3549_v61 }
 0x243   :  { %v820_v45 = vsel %vm729_vm0, %v819_v12, %v815_v16 }
 0x244   :  { %v3520_v36 = vpop.xlane.xlu0 %670  ;;  %v739_v14 = vsel %vm729_vm0, %v738_v44, %v734_v46 }
 0x245   :  { %v3522_v37 = vpop.xlane.xlu1 %632  ;;  %v867_v26 = vsel %vm866_vm1, %v739_v14, %v730_v13  ;;  %v833_v1 = vrot.slane %v3520_v36, %v3546_v59  ;;  %v881_v14 = vsel %vm868_vm2, %v820_v45, %v880_v50 }
 0x246   :  { %v747_v3 = vrot.slane %v3522_v37, %v3549_v61 }
 0x248   :  { %v3524_v38 = vpop.xlane.xlu0 %630 }
 0x249   :  { %v3526_v39 = vpop.xlane.xlu1 %640  ;;  %v743_v2 = vrot.slane %v3524_v38, %v3546_v59 }
 0x24a   :  { %v765_v22 = vrot.slane %v3526_v39, %v3549_v61 }
 0x24b   :  { %v748_v17 = vsel %vm729_vm0, %v747_v3, %v743_v2 }
 0x24c   :  { %v3528_v43 = vpop.xlane.xlu0 %638  ;;  %v869_v53 = vsel %vm868_vm2, %v748_v17, %v867_v26  ;;  %v837_v17 = vrot.slane %v3510_v32, %v3549_v61 }
 0x24d   :  { %v3530_v42 = vpop.xlane.xlu1 %668  ;;  %v761_v23 = vrot.slane %v3528_v43, %v3546_v59 }
 0x24e   :  { %v828_v18 = vrot.slane %v3530_v42, %v3549_v61 }
 0x250   :  { %v3532_v48 = vpop.xlane.xlu0 %666 }
 0x251   :  { %v3534_v49 = vpop.xlane.xlu1 %676  ;;  %v824_v19 = vrot.slane %v3532_v48, %v3546_v59 }
 0x252   :  { %v846_v44 = vrot.slane %v3534_v49, %v3549_v61 }
 0x253   :  { %v829_v2 = vsel %vm729_vm0, %v828_v18, %v824_v19 }
 0x254   :  { %v3537_v51 = vpop.xlane.xlu0 %674  ;;  %v882_v18 = vsel %vm870_vm3, %v829_v2, %v881_v14  ;;  %v3676_v14 = vsub.s32 2, %v3342_v62 }
 0x255   :  { %v3539_v52 = vpop.xlane.xlu1 %680  ;;  %v842_v3 = vrot.slane %v3537_v51, %v3546_v59 }
 0x258   :  { %v3541_v58 = vpop.xlane.xlu0 %678 }
 0x259   :  { %v3543_v41 = vpop.xlane.xlu1 %636  ;;  %v851_v8 = vrot.slane %v3541_v58, %v3546_v59 }
 0x25a   :  { %v756_v5 = vrot.slane %v3543_v41, %v3549_v61 }
 0x25c   :  { %v3551_v40 = vpop.xlane.xlu0 %634 }
 0x25d   :  { %v3553_v63 = vpop.xlane.xlu1 %644  ;;  %v752_v6 = vrot.slane %v3551_v40, %v3546_v59 }
 0x25e   :  { %v774_v24 = vrot.slane %v3553_v63, %v3549_v61 }
 0x25f   :  { %v757_v21 = vsel %vm729_vm0, %v756_v5, %v752_v6  ;;  %v766_v5 = vsel %vm729_vm0, %v765_v22, %v761_v23  ;;  %v855_v6 = vrot.slane %v3539_v52, %v3549_v61  ;;  %v838_v22 = vsel %vm729_vm0, %v837_v17, %v833_v1 }
 0x260   :  { %v3579_v9 = vpop.xlane.xlu0 %642  ;;  %v871_v47 = vsel %vm870_vm3, %v757_v21, %v869_v53  ;;  %v847_v21 = vsel %vm729_vm0, %v846_v44, %v842_v3  ;;  %v883_v45 = vsel %vm872_vm4, %v838_v22, %v882_v18  ;;  %v3690_v22 = vsub.s32 4, %v3342_v62 }
 0x261   :  { %v3581_v10 = vpop.xlane.xlu1 %648  ;;  %v770_v25 = vrot.slane %v3579_v9, %v3546_v59  ;;  %v873_v16 = vsel %vm872_vm4, %v766_v5, %v871_v47  ;;  %v856_v50 = vsel %vm729_vm0, %v855_v6, %v851_v8  ;;  %v884_v44 = vsel %vm874_vm5, %v847_v21, %v883_v45 }
 0x262   :  { %v783_v27 = vrot.slane %v3581_v10, %v3549_v61  ;;  %v885_v1 = vsel %vm876_vm6, %v856_v50, %v884_v44  ;;  %v3670_v6 = vsub.s32 1, %v3342_v62 }
 0x263   :  { %v775_v4 = vsel %vm729_vm0, %v774_v24, %v770_v25 }
 0x264   :  { %v3608_v28 = vpop.xlane.xlu0 %646  ;;  %v875_v19 = vsel %vm874_vm5, %v775_v4, %v873_v16  ;;  %v3159_v4 = vmov 0  }
 0x265   :  { %v3610_v29 = vpop.xlane.xlu1 %652  ;;  %v779_v60 = vrot.slane %v3608_v28, %v3546_v59  ;;  %2825 = vset.pattern.permute.xlu0 %v3159_v4  ;;  %2824 = vset.pattern.permute.xlu1 %v3159_v4 }
 0x266   :  { %v792_v46 = vrot.slane %v3610_v29, %v3549_v61 }
 0x267   :  { %v784_v13 = vsel %vm729_vm0, %v783_v27, %v779_v60 }
 0x268   :  { %v3633_v11 = vpop.xlane.xlu0 %650  ;;  %v877_v26 = vsel %vm876_vm6, %v784_v13, %v875_v19  ;;  %v3683_v19 = vsub.s32 3, %v3342_v62 }
 0x269   :  { %v3635_v12 = vpop.xlane.xlu1 %684  ;;  %v788_v15 = vrot.slane %v3633_v11, %v3546_v59 }
 0x26a   :  { %v864_v24 = vrot.slane %v3635_v12, %v3549_v61 }
 0x26b   :  { %v793_v25 = vsel %vm729_vm0, %v792_v46, %v788_v15 }
 0x26c   :  { %v3652_v23 = vpop.xlane.xlu0 %682  ;;  %v879_v27 = vsel %vm878_vm7, %v793_v25, %v877_v26 }
 0x26d   :  { %v860_v53 = vrot.slane %v3652_v23, %v3546_v59  ;;  %v890_v60 = vsel %vm889_vm8, %v879_v27, -inf }
 0x26e   :  { %891 = vmax.xlane.f32.xlu0 %v890_v60 }
 0x26f   :  { %v865_v47 = vsel %vm729_vm0, %v864_v24, %v860_v53 }
 0x270   :  { %v886_v2 = vsel %vm878_vm7, %v865_v47, %v885_v1  ;;  %v3704_v47 = vsub.s32 6, %v3342_v62 }
 0x271   :  { %v893_v3 = vsel %vm889_vm8, %v886_v2, -inf }
 0x272   :  { %894 = vmax.xlane.f32.xlu1 %v893_v3 }
 0x2ff   :  { %v3665_v46 = vpop.xlane.xlu1 %894 }
 0x300   :  { %v933_v5 = vrot.slane %v3665_v46, %v3352_v7  ;;  %v937_v8 = vrot.slane %v3665_v46, %v3670_v6  ;;  %v941_v15 = vrot.slane %v3665_v46, %v3676_v14  ;;  %v945_v21 = vrot.slane %v3665_v46, %v3683_v19 }
 0x301   :  { %v957_v1 = vrot.slane %v3665_v46, %v3704_v47 }
 0x302   :  { %v994_v13 = vsub.f32 %v3500_v55, %v933_v5  ;;  %v997_v16 = vsub.f32 %v3502_v56, %v937_v8  ;;  %v995_v17 = vsub.f32 %v3498_v54, %v933_v5  ;;  %v999_v24 = vsub.f32 %v3506_v57, %v941_v15 }
 0x303   :  { %v996_v25 = vsub.f32 %v3512_v33, %v937_v8  ;;  %v949_v54 = vrot.slane %v3665_v46, %v3690_v22  ;;  %v1001_v56 = vsub.f32 %v3530_v42, %v945_v21  ;;  %v998_v50 = vsub.f32 %v3516_v34, %v941_v15 }
 0x304   :  { %v1042_v18 = vmul.f32 1.442695, %v994_v13  ;;  %v1048_v55 = vmul.f32 1.442695, %v997_v16  ;;  %v1044_v26 = vmul.f32 1.442695, %v995_v17  ;;  %v1000_v44 = vsub.f32 %v3532_v48, %v945_v21 }
 0x305   :  { %v1052_v27 = vmul.f32 1.442695, %v999_v24  ;;  %v1046_v53 = vmul.f32 1.442695, %v996_v25  ;;  %v3697_v57 = vsub.s32 5, %v3342_v62  ;;  %v1003_v60 = vsub.f32 %v3510_v32, %v949_v54  ;;  %v3712_v32 = vpop.xlane.xlu0 %891 }
 0x306   :  { %2892 = vpow2.f32 %v1042_v18  ;;  %v1056_v45 = vmul.f32 1.442695, %v1001_v56  ;;  %v1050_v42 = vmul.f32 1.442695, %v998_v50  ;;  %v1002_v48 = vsub.f32 %v3520_v36, %v949_v54 }
 0x307   :  { %2894 = vpow2.f32 %v1048_v55  ;;  %v953_v33 = vrot.slane %v3665_v46, %v3697_v57  ;;  %v1060_v3 = vmul.f32 1.442695, %v1003_v60  ;;  %v1054_v4 = vmul.f32 1.442695, %v1000_v44 }
 0x308   :  { %2896 = vpow2.f32 %v1044_v26  ;;  %v901_v13 = vrot.slane %v3712_v32, %v3352_v7  ;;  %v1058_v36 = vmul.f32 1.442695, %v1002_v48  ;;  %v3732_v21 = vrot.slane %v3712_v32, %v3683_v19 }
 0x309   :  { %2898 = vpow2.f32 %v1052_v27  ;;  %v1005_v2 = vsub.f32 %v3534_v49, %v953_v33  ;;  %v1007_v49 = vsub.f32 %v3539_v52, %v957_v1  ;;  %v1004_v16 = vsub.f32 %v3537_v51, %v953_v33 }
 0x30a   :  { %2900 = vpow2.f32 %v1046_v53  ;;  %v978_v52 = vsub.f32 %v3504_v30, %v901_v13  ;;  %v1006_v51 = vsub.f32 %v3541_v58, %v957_v1  ;;  %v3744_v54 = vrot.slane %v3712_v32, %v3690_v22 }
 0x30b   :  { %2902 = vpow2.f32 %v1056_v45  ;;  %v1064_v15 = vmul.f32 1.442695, %v1005_v2  ;;  %v1068_v24 = vmul.f32 1.442695, %v1007_v49  ;;  %v1062_v55 = vmul.f32 1.442695, %v1004_v16 }
 0x30c   :  { %2904 = vpow2.f32 %v1050_v42  ;;  %v985_v30 = vsub.f32 %v3543_v41, %v3732_v21  ;;  %v1010_v56 = vmul.f32 1.442695, %v978_v52  ;;  %v905_v58 = vrot.slane %v3712_v32, %v3670_v6 }
 0x30d   :  { %2906 = vpow2.f32 %v1060_v3  ;;  %v979_v27 = vsub.f32 %v3508_v31, %v901_v13  ;;  %v1066_v50 = vmul.f32 1.442695, %v1006_v51  ;;  %v3759_v41 = vrot.slane %v3712_v32, %v3697_v57 }
 0x30e   :  { %2908 = vpow2.f32 %v1054_v4  ;;  %v987_v60 = vsub.f32 %v3526_v39, %v3744_v54  ;;  %v1024_v45 = vmul.f32 1.442695, %v985_v30  ;;  %v980_v31 = vsub.f32 %v3514_v20, %v905_v58 }
 0x30f   :  { %2910 = vpow2.f32 %v1064_v15  ;;  %v1012_v44 = vmul.f32 1.442695, %v979_v27  ;;  %v3770_v2 = vsub.s32 7, %v3342_v62  ;;  %v3775_v39 = vrot.slane %v3712_v32, %v3704_v47 }
 0x310   :  { %v3706_v34 = vpop.eup %2892  ;;  %2912 = vpow2.f32 %v1058_v36  ;;  %v989_v3 = vsub.f32 %v3553_v63, %v3759_v41  ;;  %v1028_v20 = vmul.f32 1.442695, %v987_v60  ;;  %v909_v48 = vrot.slane %v3712_v32, %v3676_v14 }
 0x311   :  { %1155 = vperm.xlu1 %2824, %v3706_v34   ;;  %v3715_v5 = vpop.eup %2894  ;;  %2914 = vpow2.f32 %v1068_v24  ;;  %4207 = vst [vmem:[#allocation26_spill] sm:$0xff] %v3770_v2  ;;  %v981_v4 = vsub.f32 %v3518_v35, %v905_v58  ;;  %v1014_v62 = vmul.f32 1.442695, %v980_v31  ;;  %v3790_v63 = vrot.slane %v3712_v32, %v3770_v2 }
 0x312   :  { %v3717_v8 = vpop.eup %2896  ;;  %1164 = vperm.xlu0 %2825, %v3715_v5   ;;  %2916 = vpow2.f32 %v1062_v55  ;;  %v991_v15 = vsub.f32 %v3581_v10, %v3775_v39  ;;  %v1032_v16 = vmul.f32 1.442695, %v989_v3  ;;  %v982_v35 = vsub.f32 %v3524_v38, %v909_v48 }
 0x313   :  { %v3725_v17 = vpop.eup %2898  ;;  %2918 = vpow2.f32 %v1010_v56  ;;  %v1016_v36 = vmul.f32 1.442695, %v981_v4  ;;  %v993_v32 = vsub.f32 %v3610_v29, %v3790_v63  ;;  %v961_v10 = vrot.slane %v3665_v46, %v3770_v2 }
 0x314   :  { %v3727_v18 = vpop.eup %2900  ;;  %2920 = vpow2.f32 %v1066_v50  ;;  %v1036_v51 = vmul.f32 1.442695, %v991_v15  ;;  %v983_v38 = vsub.f32 %v3522_v37, %v909_v48  ;;  %v1018_v55 = vmul.f32 1.442695, %v982_v35 }
 0x315   :  { %1158 = vperm.xlu1 %2824, %v3717_v8   ;;  %v3737_v25 = vpop.eup %2902  ;;  %2922 = vpow2.f32 %v1024_v45  ;;  %v1040_v58 = vmul.f32 1.442695, %v993_v32  ;;  %v1009_v29 = vsub.f32 %v3635_v12, %v961_v10  ;;  %v984_v46 = vsub.f32 %v3551_v40, %v3732_v21 }
 0x316   :  { %1170 = vperm.xlu0 %2825, %v3725_v17   ;;  %v3739_v26 = vpop.eup %2904  ;;  %2924 = vpow2.f32 %v1012_v44  ;;  %v1020_v27 = vmul.f32 1.442695, %v983_v38  ;;  %v986_v12 = vsub.f32 %v3528_v43, %v3744_v54  ;;  %v988_v21 = vsub.f32 %v3579_v9, %v3759_v41 }
 0x317   :  { %v3752_v53 = vpop.eup %2906  ;;  %2926 = vpow2.f32 %v1028_v20  ;;  %v1072_v60 = vmul.f32 1.442695, %v1009_v29  ;;  %v1022_v45 = vmul.f32 1.442695, %v984_v46  ;;  %v990_v43 = vsub.f32 %v3608_v28, %v3775_v39 }
 0x318   :  { %v3754_v33 = vpop.eup %2908  ;;  %2928 = vpow2.f32 %v1014_v62  ;;  %v1026_v44 = vmul.f32 1.442695, %v986_v12  ;;  %v1030_v54 = vmul.f32 1.442695, %v988_v21  ;;  %v992_v9 = vsub.f32 %v3633_v11, %v3790_v63 }
 0x319   :  { %1161 = vperm.xlu1 %2824, %v3727_v18   ;;  %v3765_v42 = vpop.eup %2910  ;;  %2930 = vpow2.f32 %v1032_v16  ;;  %v1034_v41 = vmul.f32 1.442695, %v990_v43  ;;  %v1008_v39 = vsub.f32 %v3652_v23, %v961_v10 }
 0x31a   :  { %1176 = vperm.xlu0 %2825, %v3737_v25   ;;  %v3767_v1 = vpop.eup %2912  ;;  %2932 = vpow2.f32 %v1016_v36  ;;  %v1038_v28 = vmul.f32 1.442695, %v992_v9 }
 0x31b   :  { %v3783_v13 = vpop.eup %2914  ;;  %2934 = vpow2.f32 %v1036_v51  ;;  %v1070_v11 = vmul.f32 1.442695, %v1008_v39 }
 0x31c   :  { %v3785_v49 = vpop.eup %2916  ;;  %2936 = vpow2.f32 %v1018_v55 }
 0x31d   :  { %1167 = vperm.xlu1 %2824, %v3739_v26   ;;  %v3796_v52 = vpop.eup %2918  ;;  %2938 = vpow2.f32 %v1040_v58 }
 0x31e   :  { %1182 = vperm.xlu0 %2825, %v3752_v53   ;;  %v3798_v24 = vpop.eup %2920  ;;  %2940 = vpow2.f32 %v1020_v27 }
 0x31f   :  { %v3807_v30 = vpop.eup %2922  ;;  %2942 = vpow2.f32 %v1072_v60 }
 0x320   :  { %4208 = vst [vmem:[#allocation27_spill] sm:$0xff] %v3807_v30  ;;  %v3809_v56 = vpop.eup %2924  ;;  %2944 = vpow2.f32 %v1022_v45 }
 0x321   :  { %1173 = vperm.xlu1 %2824, %v3754_v33   ;;  %v3816_v37 = vpop.eup %2926  ;;  %2946 = vpow2.f32 %v1026_v44 }
 0x322   :  { %1188 = vperm.xlu0 %2825, %v3765_v42   ;;  %4209 = vst [vmem:[#allocation28_spill] sm:$0xff] %v3816_v37  ;;  %v3818_v50 = vpop.eup %2928  ;;  %2948 = vpow2.f32 %v1030_v54 }
 0x323   :  { %v3824_v31 = vpop.eup %2930  ;;  %2950 = vpow2.f32 %v1034_v41 }
 0x324   :  { %4210 = vst [vmem:[#allocation29_spill] sm:$0xff] %v3824_v31  ;;  %v3826_v40 = vpop.eup %2932  ;;  %2952 = vpow2.f32 %v1038_v28 }
 0x325   :  { %1179 = vperm.xlu1 %2824, %v3767_v1   ;;  %v3832_v3 = vpop.eup %2934  ;;  %2954 = vpow2.f32 %v1070_v11 }
 0x326   :  { %1194 = vperm.xlu0 %2825, %v3783_v13   ;;  %4211 = vst [vmem:[#allocation30_spill] sm:$0xff] %v3832_v3  ;;  %v3834_v20 = vpop.eup %2936 }
 0x327   :  { %4212 = vst [vmem:[#allocation31_spill] sm:$0xff] %v3834_v20  ;;  %v3840_v48 = vpop.eup %2938 }
 0x328   :  { %4213 = vst [vmem:[#allocation32_spill] sm:$0xff] %v3840_v48  ;;  %v3842_v4 = vpop.eup %2940 }
 0x329   :  { %1185 = vperm.xlu1 %2824, %v3785_v49   ;;  %4214 = vst [vmem:[#allocation33_spill] sm:$0xff] %v3842_v4  ;;  %v3848_v62 = vpop.eup %2942 }
 0x32a   :  { %1107 = vperm.xlu0 %2825, %v3796_v52   ;;  %4215 = vst [vmem:[#allocation34_spill] sm:$0xff] %v3848_v62  ;;  %v3850_v15 = vpop.eup %2944 }
 0x32b   :  { %4216 = vst [vmem:[#allocation35_spill] sm:$0xff] %v3850_v15  ;;  %v3855_v16 = vpop.eup %2946 }
 0x32c   :  { %4217 = vst [vmem:[#allocation36_spill] sm:$0xff] %v3855_v16  ;;  %v3858_v63 = vpop.eup %2948 }
 0x32d   :  { %1191 = vperm.xlu1 %2824, %v3798_v24   ;;  %4218 = vst [vmem:[#allocation37_spill] sm:$0xff] %v3858_v63  ;;  %v3861_v35 = vpop.eup %2950 }
 0x32e   :  { %1128 = vperm.xlu0 %2825, %v3807_v30   ;;  %4219 = vst [vmem:[#allocation38_spill] sm:$0xff] %v3861_v35  ;;  %v3864_v36 = vpop.eup %2952 }
 0x32f   :  { %4220 = vst [vmem:[#allocation39_spill] sm:$0xff] %v3864_v36  ;;  %v3867_v23 = vpop.eup %2954 }
 0x330   :  { %4221 = vst [vmem:[#allocation40_spill] sm:$0xff] %v3867_v23 }
 0x331   :  { %1110 = vperm.xlu1 %2824, %v3809_v56  }
 0x332   :  { %1134 = vperm.xlu0 %2825, %v3816_v37  }
 0x335   :  { %1113 = vperm.xlu1 %2824, %v3818_v50  }
 0x336   :  { %1140 = vperm.xlu0 %2825, %v3824_v31  }
 0x339   :  { %1116 = vperm.xlu1 %2824, %v3826_v40  }
 0x33a   :  { %1146 = vperm.xlu0 %2825, %v3832_v3  }
 0x33d   :  { %1119 = vperm.xlu1 %2824, %v3834_v20  }
 0x33e   :  { %1152 = vperm.xlu0 %2825, %v3840_v48  }
 0x341   :  { %1122 = vperm.xlu1 %2824, %v3842_v4  }
 0x342   :  { %1200 = vperm.xlu0 %2825, %v3848_v62  }
 0x345   :  { %1125 = vperm.xlu1 %2824, %v3850_v15  }
 0x349   :  { %1131 = vperm.xlu1 %2824, %v3855_v16  }
 0x34d   :  { %1137 = vperm.xlu1 %2824, %v3858_v63  }
 0x351   :  { %1143 = vperm.xlu1 %2824, %v3861_v35  }
 0x355   :  { %1149 = vperm.xlu1 %2824, %v3864_v36  }
 0x359   :  { %1197 = vperm.xlu1 %2824, %v3867_v23  }
 0x390   :  { %v1156_v32 = vpop.permute.xlu1 %1155 }
 0x391   :  { %v1165_v51 = vpop.permute.xlu0 %1164  ;;  %v1277_v2 = vrot.slane %v1156_v32, %v3546_v59 }
 0x392   :  { %v1290_v31 = vrot.slane %v1165_v51, %v3549_v61 }
 0x394   :  { %v1159_v10 = vpop.permute.xlu1 %1158 }
 0x395   :  { %v1171_v38 = vpop.permute.xlu0 %1170  ;;  %v1281_v36 = vrot.slane %v1159_v10, %v3549_v61 }
 0x396   :  { %v1299_v20 = vrot.slane %v1171_v38, %v3549_v61 }
 0x397   :  { %v1282_v16 = vsel %vm729_vm0, %v1281_v36, %v1277_v2 }
 0x398   :  { %v1162_v55 = vpop.permute.xlu1 %1161 }
 0x399   :  { %v1177_v58 = vpop.permute.xlu0 %1176  ;;  %v1286_v35 = vrot.slane %v1162_v55, %v3546_v59 }
 0x39b   :  { %v1291_v4 = vsel %vm729_vm0, %v1290_v31, %v1286_v35 }
 0x39c   :  { %v1168_v29 = vpop.permute.xlu1 %1167 }
 0x39d   :  { %v3870_v46 = vpop.permute.xlu0 %1182  ;;  %v1295_v37 = vrot.slane %v1168_v29, %v3546_v59 }
 0x3a0   :  { %v1174_v27 = vpop.permute.xlu1 %1173 }
 0x3a1   :  { %v3874_v12 = vpop.permute.xlu0 %1188 }
 0x3a4   :  { %v3872_v60 = vpop.permute.xlu1 %1179 }
 0x3a5   :  { %v3878_v21 = vpop.permute.xlu0 %1194 }
 0x3a8   :  { %v3876_v45 = vpop.permute.xlu1 %1185 }
 0x3a9   :  { %v1108_v54 = vpop.permute.xlu0 %1107 }
 0x3aa   :  { %v1205_v36 = vrot.slane %v1108_v54, %v3546_v59 }
 0x3ac   :  { %v3880_v44 = vpop.permute.xlu1 %1191 }
 0x3ad   :  { %v1129_v41 = vpop.permute.xlu0 %1128 }
 0x3b0   :  { %v1111_v43 = vpop.permute.xlu1 %1110 }
 0x3b1   :  { %v1135_v11 = vpop.permute.xlu0 %1134  ;;  %v1209_v10 = vrot.slane %v1111_v43, %v3549_v61  ;;  %v1300_v43 = vsel %vm729_vm0, %v1299_v20, %v1295_v37 }
 0x3b2   :  { %v1245_v31 = vrot.slane %v1135_v11, %v3549_v61 }
 0x3b4   :  { %v1114_v9 = vpop.permute.xlu1 %1113 }
 0x3b5   :  { %v1141_v23 = vpop.permute.xlu0 %1140  ;;  %v1214_v32 = vrot.slane %v1114_v9, %v3546_v59 }
 0x3b6   :  { %v1254_v54 = vrot.slane %v1141_v23, %v3549_v61 }
 0x3b8   :  { %v1117_v28 = vpop.permute.xlu1 %1116 }
 0x3b9   :  { %v1147_v3 = vpop.permute.xlu0 %1146  ;;  %v1218_v63 = vrot.slane %v1117_v28, %v3549_v61  ;;  %v1308_v28 = vrot.slane %v1177_v58, %v3549_v61 }
 0x3ba   :  { %v1263_v20 = vrot.slane %v1147_v3, %v3549_v61 }
 0x3bb   :  { %v1219_v38 = vsel %vm729_vm0, %v1218_v63, %v1214_v32 }
 0x3bc   :  { %v1120_v39 = vpop.permute.xlu1 %1119 }
 0x3bd   :  { %v1223_v51 = vrot.slane %v1120_v39, %v3546_v59  ;;  %v1153_v35 = vpop.permute.xlu0 %1152  ;;  %v1322_v39 = vrot.slane %v3876_v45, %v3546_v59 }
 0x3c0   :  { %v1123_v0 = vpop.permute.xlu1 %1122 }
 0x3c1   :  { %v1227_v15 = vrot.slane %v1123_v0, %v3549_v61  ;;  %v1236_v0 = vrot.slane %v1129_v41, %v3549_v61 }
 0x3c3   :  { %v1228_v58 = vsel %vm729_vm0, %v1227_v15, %v1223_v51  ;;  %v1317_v15 = vrot.slane %v3870_v46, %v3549_v61  ;;  %v1326_v46 = vrot.slane %v3874_v12, %v3549_v61  ;;  %v1272_v51 = vrot.slane %v1153_v35, %v3549_v61 }
 0x3c4   :  { %v1126_v62 = vpop.permute.xlu1 %1125 }
 0x3c5   :  { %v1232_v55 = vrot.slane %v1126_v62, %v3546_v59  ;;  %v1304_v62 = vrot.slane %v1174_v27, %v3546_v59  ;;  %v1327_v12 = vsel %vm729_vm0, %v1326_v46, %v1322_v39 }
 0x3c7   :  { %v1237_v41 = vsel %vm729_vm0, %v1236_v0, %v1232_v55  ;;  %v1201_v0 = vpop.permute.xlu0 %1200 }
 0x3c8   :  { %v1132_v48 = vpop.permute.xlu1 %1131 }
 0x3c9   :  { %v1241_v2 = vrot.slane %v1132_v48, %v3546_v59  ;;  %v1210_v48 = vsel %vm729_vm0, %v1209_v10, %v1205_v36  ;;  %v1309_v10 = vsel %vm729_vm0, %v1308_v28, %v1304_v62  ;;  %v1353_v36 = vsel %vm866_vm1, %v1291_v4, %v1282_v16 }
 0x3ca   :  { %v1346_v37 = vsel %vm866_vm1, %v1219_v38, %v1210_v48 }
 0x3cb   :  { %v1246_v27 = vsel %vm729_vm0, %v1245_v31, %v1241_v2  ;;  %v1347_v23 = vsel %vm868_vm2, %v1228_v58, %v1346_v37 }
 0x3cc   :  { %v1138_v30 = vpop.permute.xlu1 %1137  ;;  %v1348_v32 = vsel %vm870_vm3, %v1237_v41, %v1347_v23 }
 0x3cd   :  { %v1250_v29 = vrot.slane %v1138_v30, %v3546_v59  ;;  %v1313_v30 = vrot.slane %v3872_v60, %v3546_v59  ;;  %v1331_v60 = vrot.slane %v3880_v44, %v3546_v59  ;;  %v1349_v45 = vsel %vm872_vm4, %v1246_v27, %v1348_v32 }
 0x3ce   :  { %v1335_v44 = vrot.slane %v3878_v21, %v3549_v61 }
 0x3cf   :  { %v1255_v11 = vsel %vm729_vm0, %v1254_v54, %v1250_v29  ;;  %v1318_v28 = vsel %vm729_vm0, %v1317_v15, %v1313_v30  ;;  %v1354_v29 = vsel %vm868_vm2, %v1300_v43, %v1353_v36 }
 0x3d0   :  { %v1144_v9 = vpop.permute.xlu1 %1143  ;;  %v1350_v38 = vsel %vm874_vm5, %v1255_v11, %v1349_v45  ;;  %v1355_v35 = vsel %vm870_vm3, %v1309_v10, %v1354_v29  ;;  %v1336_v4 = vsel %vm729_vm0, %v1335_v44, %v1331_v60 }
 0x3d1   :  { %v1259_v63 = vrot.slane %v1144_v9, %v3546_v59  ;;  %v1356_v21 = vsel %vm872_vm4, %v1318_v28, %v1355_v35  ;;  %v1344_v9 = vrot.slane %v1201_v0, %v3549_v61 }
 0x3d2   :  { %v1357_v54 = vsel %vm874_vm5, %v1327_v12, %v1356_v21  ;;  %v4225_v12 = vld [vmem:[#allocation35_spill] sm:$0xff] }
 0x3d3   :  { %v1264_v3 = vsel %vm729_vm0, %v1263_v20, %v1259_v63  ;;  %v1358_v63 = vsel %vm876_vm6, %v1336_v4, %v1357_v54 }
 0x3d4   :  { %v1150_v55 = vpop.permute.xlu1 %1149  ;;  %v1351_v31 = vsel %vm876_vm6, %v1264_v3, %v1350_v38  ;;  %v4223_v38 = vld [vmem:[#allocation31_spill] sm:$0xff] }
 0x3d5   :  { %v1268_v2 = vrot.slane %v1150_v55, %v3546_v59 }
 0x3d7   :  { %v1273_v62 = vsel %vm729_vm0, %v1272_v51, %v1268_v2 }
 0x3d8   :  { %v1198_v16 = vpop.permute.xlu1 %1197  ;;  %v1352_v58 = vsel %vm878_vm7, %v1273_v62, %v1351_v31  ;;  %v4227_v31 = vld [vmem:[#allocation36_spill] sm:$0xff] }
 0x3d9   :  { %v1340_v48 = vrot.slane %v1198_v16, %v3546_v59  ;;  %v1362_v43 = vsel %vm889_vm8, %v1352_v58, 0.0  ;;  %v4228_v16 = vld [vmem:[#allocation29_spill] sm:$0xff] }
 0x3da   :  { %1363 = vadd.xlane.f32.xlu1 %v1362_v43  ;;  %v4229_v58 = vld [vmem:[#allocation37_spill] sm:$0xff]  ;;  %v4231_v43 = vld [vmem:[#allocation38_spill] sm:$0xff] }
 0x3db   :  { %v1345_v41 = vsel %vm729_vm0, %v1344_v9, %v1340_v48  ;;  %v4230_v48 = vld [vmem:[#allocation30_spill] sm:$0xff] }
 0x3dc   :  { %v1359_v30 = vsel %vm878_vm7, %v1345_v41, %v1358_v63  ;;  %v4232_v41 = vld [vmem:[#allocation26_spill] sm:$0xff] }
 0x3dd   :  { %v1365_v37 = vsel %vm889_vm8, %v1359_v30, 0.0  ;;  %v4233_v30 = vld [vmem:[#allocation32_spill] sm:$0xff] }
 0x3de   :  { %1366 = vadd.xlane.f32.xlu0 %v1365_v37  ;;  %v4234_v37 = vld [vmem:[#allocation39_spill] sm:$0xff] }
 0x467   :  { %v1364_v3 = vpop.xlane.xlu1 %1363 }
 0x46b   :  { %v1367_v20 = vpop.xlane.xlu0 %1366 }
 0x46c   :  { %2956 = vrcp.f32 %v1367_v20 }
 0x46d   :  { %2958 = vrcp.f32 %v1364_v3  ;;  %v3160_v3 = vmov 0.0|0.0  }
 0x46e   :  { %2735 = vmatprep.subr.bf16.mxu1 %v3160_v3  ;;  %2738 = vmatprep.subr.bf16.mxu0 %v3160_v3 }
 0x476   :  { %v3952_v27 = vpop.eup %2956 }
 0x477   :  { %v1407_v15 = vrot.slane %v3952_v27, %v3352_v7  ;;  %v1411_v11 = vrot.slane %v3952_v27, %v3670_v6  ;;  %v1415_v32 = vrot.slane %v3952_v27, %v3676_v14  ;;  %v1423_v46 = vrot.slane %v3952_v27, %v3690_v22  ;;  %v2959_v2 = vpop.eup %2958 }
 0x478   :  { %v1395_v4 = vrot.slane %v2959_v2, %v3697_v57  ;;  %v1399_v9 = vrot.slane %v2959_v2, %v3704_v47  ;;  %v1403_v63 = vrot.slane %v2959_v2, %v4232_v41 }
 0x479   :  { %v1469_v39 = vmul.f32 %v3717_v8, %v1407_v15  ;;  %v1468_v23 = vmul.f32 %v3706_v34, %v1407_v15  ;;  %v1471_v10 = vmul.f32 %v3715_v5, %v1411_v11  ;;  %v1470_v60 = vmul.f32 %v3727_v18, %v1411_v11 }
 0x47a   :  { %v1473_v55 = vmul.f32 %v3725_v17, %v1415_v32  ;;  %v1472_v8 = vmul.f32 %v3739_v26, %v1415_v32  ;;  %v1419_v34 = vrot.slane %v3952_v27, %v3683_v19  ;;  %v1477_v51 = vmul.f32 %v3752_v53, %v1423_v46 }
 0x47b   :  { %1568 = vperm.xlu0 %2825, %v1469_v39   ;;  %1565 = vperm.xlu1 %2824, %v1468_v23   ;;  %v1476_v17 = vmul.f32 %v3767_v1, %v1423_v46  ;;  %v1427_v26 = vrot.slane %v3952_v27, %v3697_v57  ;;  %v1375_v1 = vrot.slane %v2959_v2, %v3352_v7  ;;  %v4236_v23 = vld [vmem:[#allocation40_spill] sm:$0xff] }
 0x47c   :  { %v1475_v5 = vmul.f32 %v3737_v25, %v1419_v34  ;;  %v1474_v18 = vmul.f32 %v3754_v33, %v1419_v34  ;;  %v1431_v33 = vrot.slane %v3952_v27, %v3704_v47  ;;  %v1462_v21 = vmul.f32 %v4229_v58, %v1395_v4  ;;  %v4235_v47 = vld [vmem:[#allocation34_spill] sm:$0xff] }
 0x47d   :  { %v1479_v45 = vmul.f32 %v3765_v42, %v1427_v26  ;;  %v1478_v25 = vmul.f32 %v3785_v49, %v1427_v26  ;;  %v1452_v28 = vmul.f32 %v3796_v52, %v1375_v1  ;;  %v1453_v42 = vmul.f32 %v3809_v56, %v1375_v1  ;;  %v4224_v56 = vld [vmem:[#allocation27_spill] sm:$0xff] }
 0x47e   :  { %v1481_v36 = vmul.f32 %v3783_v13, %v1431_v33  ;;  %v1480_v53 = vmul.f32 %v3798_v24, %v1431_v33  ;;  %v1379_v49 = vrot.slane %v2959_v2, %v3670_v6  ;;  %v1383_v13 = vrot.slane %v2959_v2, %v3676_v14  ;;  %v4222_v24 = vld [vmem:[#allocation33_spill] sm:$0xff] }
 0x47f   :  { %1574 = vperm.xlu0 %2825, %v1471_v10   ;;  %1571 = vperm.xlu1 %2824, %v1470_v60   ;;  %v1387_v52 = vrot.slane %v2959_v2, %v3683_v19  ;;  %v1463_v19 = vmul.f32 %v4228_v16, %v1395_v4  ;;  %v1464_v54 = vmul.f32 %v4231_v43, %v1399_v9  ;;  %v1776_v10 = vld [vmem:[#allocation8] sm:$0xff]  ;;  %v1777_v60 = vld [vmem:[#allocation8 + $0x8] sm:$0xff]  ;;  %v3162_v34 = vmov 0.0  }
 0x480   :  { %v1455_v44 = vmul.f32 %v3826_v40, %v1379_v49  ;;  %v1454_v0 = vmul.f32 %v3818_v50, %v1379_v49  ;;  %v1457_v7 = vmul.f32 %v4222_v24, %v1383_v13  ;;  %v1456_v29 = vmul.f32 %v4223_v38, %v1383_v13  ;;  %v4226_v50 = vld [vmem:[#allocation28_spill] sm:$0xff]  ;;  %2591 = vmatprep.mubr.msk.f32.mxu1 %vm3161_vm9, %v3162_v34 }
 0x481   :  { %v1459_v6 = vmul.f32 %v4224_v56, %v1387_v52  ;;  %v1458_v62 = vmul.f32 %v4225_v12, %v1387_v52  ;;  %v1391_v40 = vrot.slane %v2959_v2, %v3690_v22  ;;  %v1465_v22 = vmul.f32 %v4230_v48, %v1399_v9  ;;  %2598 = vmatprep.mubr.msk.f32.mxu0 %vm3161_vm9, %v3162_v34 }
 0x482   :  { %v1467_v57 = vmul.f32 %v4233_v30, %v1403_v63  ;;  %v1466_v20 = vmul.f32 %v4234_v37, %v1403_v63  ;;  %v1435_v15 = vrot.slane %v3952_v27, %v4232_v41  ;;  %v2736_v32 = vpack.c.bf16 %v1777_v60, %v1776_v10 }
 0x483   :  { %1580 = vperm.xlu0 %2825, %v1473_v55   ;;  %1577 = vperm.xlu1 %2824, %v1472_v8   ;;  %v1461_v14 = vmul.f32 %v4226_v50, %v1391_v40  ;;  %v1460_v35 = vmul.f32 %v4227_v31, %v1391_v40  ;;  %v1778_v55 = vld [vmem:[#allocation8 + $0x10] sm:$0xff]  ;;  %v1779_v8 = vld [vmem:[#allocation8 + $0x18] sm:$0xff] }
 0x484   :  { %v1483_v39 = vmul.f32 %v4235_v47, %v1435_v15  ;;  %v1482_v11 = vmul.f32 %v4236_v23, %v1435_v15  ;;  %2737 = vmatpush3.bf16.msra.mxu1 %v2736_v32  ;;  %v2739_v27 = vpack.c.bf16 %v1779_v8, %v1778_v55 }
 0x486   :  { %2740 = vmatpush3.bf16.msra.mxu0 %v2739_v27 }
 0x487   :  { %1586 = vperm.xlu0 %2825, %v1475_v5   ;;  %1583 = vperm.xlu1 %2824, %v1474_v18   ;;  %v1942_v5 = vld [vmem:[#allocation14] sm:$0xff]  ;;  %v1943_v18 = vld [vmem:[#allocation14 + $0x8] sm:$0xff] }
 0x488   :  { %v4010_v46 = vpack.c.bf16 %v1943_v18, %v1942_v5 }
 0x48a   :  { %2742 = vmatprep.subr.bf16.mxu1 %v4010_v46 }
 0x48b   :  { %1592 = vperm.xlu0 %2825, %v1477_v51   ;;  %1589 = vperm.xlu1 %2824, %v1476_v17  }
 0x48f   :  { %1598 = vperm.xlu0 %2825, %v1479_v45   ;;  %1595 = vperm.xlu1 %2824, %v1478_v25  }
 0x493   :  { %1604 = vperm.xlu0 %2825, %v1481_v36   ;;  %1601 = vperm.xlu1 %2824, %v1480_v53  }
 0x497   :  { %1517 = vperm.xlu0 %2825, %v1452_v28   ;;  %1520 = vperm.xlu1 %2824, %v1453_v42  }
 0x49b   :  { %1526 = vperm.xlu0 %2825, %v1455_v44   ;;  %1523 = vperm.xlu1 %2824, %v1454_v0  }
 0x49f   :  { %1532 = vperm.xlu0 %2825, %v1457_v7   ;;  %1529 = vperm.xlu1 %2824, %v1456_v29  }
 0x4a3   :  { %1538 = vperm.xlu0 %2825, %v1459_v6   ;;  %1535 = vperm.xlu1 %2824, %v1458_v62  }
 0x4a7   :  { %1544 = vperm.xlu0 %2825, %v1461_v14   ;;  %1541 = vperm.xlu1 %2824, %v1460_v35  }
 0x4ab   :  { %1550 = vperm.xlu0 %2825, %v1463_v19   ;;  %1547 = vperm.xlu1 %2824, %v1462_v21  }
 0x4af   :  { %1556 = vperm.xlu0 %2825, %v1465_v22   ;;  %1553 = vperm.xlu1 %2824, %v1464_v54  }
 0x4b3   :  { %1562 = vperm.xlu0 %2825, %v1467_v57   ;;  %1559 = vperm.xlu1 %2824, %v1466_v20  }
 0x4b7   :  { %1610 = vperm.xlu0 %2825, %v1483_v39   ;;  %1607 = vperm.xlu1 %2824, %v1482_v11  }
 0x4fa   :  { %v1569_v51 = vpop.permute.xlu0 %1568  ;;  %v1566_v17 = vpop.permute.xlu1 %1565 }
 0x4fb   :  { %v1691_v62 = vrot.slane %v1569_v51, %v3549_v61  ;;  %v1687_v40 = vrot.slane %v1566_v17, %v3546_v59 }
 0x4fd   :  { %v1692_v41 = vsel %vm729_vm0, %v1691_v62, %v1687_v40 }
 0x4fe   :  { %v1575_v26 = vpop.permute.xlu0 %1574  ;;  %v1572_v45 = vpop.permute.xlu1 %1571 }
 0x4ff   :  { %v1700_v50 = vrot.slane %v1575_v26, %v3549_v61  ;;  %v1696_v14 = vrot.slane %v1572_v45, %v3546_v59 }
 0x501   :  { %v1701_v57 = vsel %vm729_vm0, %v1700_v50, %v1696_v14 }
 0x502   :  { %v1581_v25 = vpop.permute.xlu0 %1580  ;;  %v1578_v33 = vpop.permute.xlu1 %1577 }
 0x503   :  { %v1709_v4 = vrot.slane %v1581_v25, %v3549_v61  ;;  %v1705_v16 = vrot.slane %v1578_v33, %v3546_v59 }
 0x505   :  { %v1710_v47 = vsel %vm729_vm0, %v1709_v4, %v1705_v16 }
 0x506   :  { %v4013_v2 = vpop.permute.xlu0 %1586  ;;  %v4015_v36 = vpop.permute.xlu1 %1583 }
 0x507   :  { %v1718_v39 = vrot.slane %v4013_v2, %v3549_v61  ;;  %v1714_v23 = vrot.slane %v4015_v36, %v3546_v59 }
 0x50a   :  { %v4017_v53 = vpop.permute.xlu0 %1592  ;;  %v4019_v1 = vpop.permute.xlu1 %1589 }
 0x50b   :  { %v1727_v34 = vrot.slane %v4017_v53, %v3549_v61  ;;  %v1723_v27 = vrot.slane %v4019_v1, %v3546_v59 }
 0x50e   :  { %v4021_v28 = vpop.permute.xlu0 %1598  ;;  %v4023_v42 = vpop.permute.xlu1 %1595 }
 0x50f   :  { %v1736_v51 = vrot.slane %v4021_v28, %v3549_v61  ;;  %v1732_v17 = vrot.slane %v4023_v42, %v3546_v59  ;;  %v1719_v28 = vsel %vm729_vm0, %v1718_v39, %v1714_v23 }
 0x512   :  { %v4025_v49 = vpop.permute.xlu0 %1604  ;;  %v4027_v44 = vpop.permute.xlu1 %1601 }
 0x513   :  { %v1745_v25 = vrot.slane %v4025_v49, %v3549_v61  ;;  %v1741_v33 = vrot.slane %v4027_v44, %v3546_v59  ;;  %v1728_v49 = vsel %vm729_vm0, %v1727_v34, %v1723_v27 }
 0x516   :  { %v1518_v0 = vpop.permute.xlu0 %1517  ;;  %v1521_v13 = vpop.permute.xlu1 %1520 }
 0x517   :  { %v1615_v48 = vrot.slane %v1518_v0, %v3546_v59  ;;  %v1619_v22 = vrot.slane %v1521_v13, %v3549_v61 }
 0x519   :  { %v1620_v32 = vsel %vm729_vm0, %v1619_v22, %v1615_v48  ;;  %v1946_v22 = vld [vmem:[#allocation14 + $0x20] sm:$0xff] }
 0x51a   :  { %v1527_v24 = vpop.permute.xlu0 %1526  ;;  %v1524_v7 = vpop.permute.xlu1 %1523 }
 0x51b   :  { %v1628_v31 = vrot.slane %v1527_v24, %v3549_v61  ;;  %v1624_v35 = vrot.slane %v1524_v7, %v3546_v59  ;;  %v1763_v24 = vsel %vm866_vm1, %v1701_v57, %v1692_v41 }
 0x51c   :  { %v1764_v7 = vsel %vm868_vm2, %v1710_v47, %v1763_v24  ;;  %v1949_v47 = vld [vmem:[#allocation14 + $0x38] sm:$0xff]  ;;  %v1954_v24 = vld [vmem:[#allocation14 + $0x60] sm:$0xff] }
 0x51d   :  { %v1629_v37 = vsel %vm729_vm0, %v1628_v31, %v1624_v35 }
 0x51e   :  { %v1533_v38 = vpop.permute.xlu0 %1532  ;;  %v1530_v29 = vpop.permute.xlu1 %1529  ;;  %v1756_v5 = vsel %vm866_vm1, %v1629_v37, %v1620_v32 }
 0x51f   :  { %v1637_v19 = vrot.slane %v1533_v38, %v3549_v61  ;;  %v1633_v58 = vrot.slane %v1530_v29, %v3546_v59  ;;  %v1737_v38 = vsel %vm729_vm0, %v1736_v51, %v1732_v17  ;;  %v1951_v51 = vld [vmem:[#allocation14 + $0x48] sm:$0xff] }
 0x521   :  { %v1638_v11 = vsel %vm729_vm0, %v1637_v19, %v1633_v58  ;;  %v1944_v58 = vld [vmem:[#allocation14 + $0x10] sm:$0xff] }
 0x522   :  { %v1539_v52 = vpop.permute.xlu0 %1538  ;;  %v1536_v56 = vpop.permute.xlu1 %1535  ;;  %v1757_v26 = vsel %vm868_vm2, %v1638_v11, %v1756_v5 }
 0x523   :  { %v1646_v43 = vrot.slane %v1539_v52, %v3549_v61  ;;  %v1642_v54 = vrot.slane %v1536_v56, %v3546_v59  ;;  %v1765_v56 = vsel %vm870_vm3, %v1719_v28, %v1764_v7  ;;  %v1952_v28 = vld [vmem:[#allocation14 + $0x50] sm:$0xff] }
 0x524   :  { %v1766_v50 = vsel %vm872_vm4, %v1728_v49, %v1765_v56  ;;  %v1955_v49 = vld [vmem:[#allocation14 + $0x68] sm:$0xff]  ;;  %v1956_v7 = vld [vmem:[#allocation14 + $0x70] sm:$0xff] }
 0x525   :  { %v1647_v3 = vsel %vm729_vm0, %v1646_v43, %v1642_v54  ;;  %v1767_v35 = vsel %vm874_vm5, %v1737_v38, %v1766_v50  ;;  %v1947_v43 = vld [vmem:[#allocation14 + $0x28] sm:$0xff]  ;;  %v1957_v38 = vld [vmem:[#allocation14 + $0x78] sm:$0xff]  ;;  %v1930_v50 = vld [vmem:[#allocation13 + $0x20] sm:$0xff] }
 0x526   :  { %v1545_v6 = vpop.permute.xlu0 %1544  ;;  %v1542_v12 = vpop.permute.xlu1 %1541  ;;  %v1758_v2 = vsel %vm870_vm3, %v1647_v3, %v1757_v26  ;;  %v2749_v37 = vpack.c.bf16 %v1947_v43, %v1946_v22  ;;  %v1927_v56 = vld [vmem:[#allocation13 + $0x8] sm:$0xff]  ;;  %v1937_v22 = vld [vmem:[#allocation13 + $0x58] sm:$0xff] }
 0x527   :  { %v1655_v63 = vrot.slane %v1545_v6, %v3549_v61  ;;  %v1651_v30 = vrot.slane %v1542_v12, %v3546_v59  ;;  %v1746_v6 = vsel %vm729_vm0, %v1745_v25, %v1741_v33 }
 0x528   :  { %v1768_v4 = vsel %vm876_vm6, %v1746_v6, %v1767_v35 }
 0x529   :  { %v1656_v18 = vsel %vm729_vm0, %v1655_v63, %v1651_v30 }
 0x52a   :  { %v1551_v21 = vpop.permute.xlu0 %1550  ;;  %v1548_v9 = vpop.permute.xlu1 %1547  ;;  %v1759_v42 = vsel %vm872_vm4, %v1656_v18, %v1758_v2  ;;  %v1950_v18 = vld [vmem:[#allocation14 + $0x40] sm:$0xff] }
 0x52b   :  { %v1664_v20 = vrot.slane %v1551_v21, %v3549_v61  ;;  %v1660_v15 = vrot.slane %v1548_v9, %v3546_v59  ;;  %v1945_v21 = vld [vmem:[#allocation14 + $0x18] sm:$0xff]  ;;  %v2757_v2 = vpack.c.bf16 %v1951_v51, %v1950_v18 }
 0x52c   :  { %v2745_v9 = vpack.c.bf16 %v1945_v21, %v1944_v58  ;;  %v1934_v58 = vld [vmem:[#allocation13 + $0x40] sm:$0xff]  ;;  %v1935_v21 = vld [vmem:[#allocation13 + $0x48] sm:$0xff] }
 0x52d   :  { %v1665_v45 = vsel %vm729_vm0, %v1664_v20, %v1660_v15  ;;  %v1948_v15 = vld [vmem:[#allocation14 + $0x30] sm:$0xff] }
 0x52e   :  { %v1557_v10 = vpop.permute.xlu0 %1556  ;;  %v1554_v60 = vpop.permute.xlu1 %1553  ;;  %v1760_v44 = vsel %vm874_vm5, %v1665_v45, %v1759_v42  ;;  %v1953_v42 = vld [vmem:[#allocation14 + $0x58] sm:$0xff] }
 0x52f   :  { %v1673_v55 = vrot.slane %v1557_v10, %v3549_v61  ;;  %v1669_v8 = vrot.slane %v1554_v60, %v3546_v59 }
 0x531   :  { %v1674_v36 = vsel %vm729_vm0, %v1673_v55, %v1669_v8  ;;  %v2753_v8 = vpack.c.bf16 %v1949_v47, %v1948_v15 }
 0x532   :  { %v1563_v53 = vpop.permute.xlu0 %1562  ;;  %v1560_v1 = vpop.permute.xlu1 %1559  ;;  %v1761_v29 = vsel %vm876_vm6, %v1674_v36, %v1760_v44  ;;  %v2765_v44 = vpack.c.bf16 %v1955_v49, %v1954_v24 }
 0x533   :  { %v1682_v0 = vrot.slane %v1563_v53, %v3549_v61  ;;  %v1678_v13 = vrot.slane %v1560_v1, %v3546_v59 }
 0x535   :  { %v1683_v52 = vsel %vm729_vm0, %v1682_v0, %v1678_v13  ;;  %v2761_v13 = vpack.c.bf16 %v1953_v42, %v1952_v28 }
 0x536   :  { %v1762_v12 = vsel %vm878_vm7, %v1683_v52, %v1761_v29  ;;  %v1611_v62 = vpop.permute.xlu0 %1610  ;;  %v1608_v40 = vpop.permute.xlu1 %1607  ;;  %v2769_v29 = vpack.c.bf16 %v1957_v38, %v1956_v7  ;;  %v1926_v52 = vld [vmem:[#allocation13] sm:$0xff] }
 0x537   :  { %1772 = vst.msk [vmem:[#allocation4] sm:$0xff] %vm889_vm8, %v1762_v12  ;;  %v1754_v14 = vrot.slane %v1611_v62, %v3549_v61  ;;  %v1750_v31 = vrot.slane %v1608_v40, %v3546_v59  ;;  %v4237_v61 = vld [vmem:[#allocation25_spill] sm:$0xff]  ;;  %v2960_v59 = vld [vmem:[#allocation5] sm:$0xff]  ;;  %v2773_v6 = vpack.c.bf16 %v1927_v56, %v1926_v52  ;;  %v1929_v62 = vld [vmem:[#allocation13 + $0x18] sm:$0xff] }
 0x538   :  { %v1928_v12 = vld [vmem:[#allocation13 + $0x10] sm:$0xff] }
 0x539   :  { %v1755_v16 = vsel %vm729_vm0, %v1754_v14, %v1750_v31  ;;  %v2777_v40 = vpack.c.bf16 %v1929_v62, %v1928_v12  ;;  %v1931_v14 = vld [vmem:[#allocation13 + $0x28] sm:$0xff]  ;;  %v2961_v31 = vld [vmem:[#allocation5 + $0x8] sm:$0xff] }
 0x53a   :  { %v1769_v19 = vsel %vm878_vm7, %v1755_v16, %v1768_v4  ;;  %v2781_v35 = vpack.c.bf16 %v1931_v14, %v1930_v50  ;;  %v1932_v4 = vld [vmem:[#allocation13 + $0x30] sm:$0xff]  ;;  %v1933_v16 = vld [vmem:[#allocation13 + $0x38] sm:$0xff] }
 0x53b   :  { %1773 = vst.msk [vmem:[#allocation4 + $0x8] sm:$0xff] %vm889_vm8, %v1769_v19  ;;  %v2785_v19 = vpack.c.bf16 %v1933_v16, %v1932_v4 }
 0x53e   :  { %v2183_v48 = vld [vmem:[#allocation4] sm:$0xff] }
 0x53f   :  { %v2185_v54 = vcombine.high %v2183_v48, %v2183_v48  ;;  %v2192_v41 = vrot.slane %v2183_v48, %v4237_v61  ;;  %2592 = vmatmul.mubr.msk.f32.vlgmr.msra.gmra.mrb[0].mxu1 %vm889_vm8, %v2183_v48  ;;  %v1936_v48 = vld [vmem:[#allocation13 + $0x50] sm:$0xff] }
 0x540   :  { %2744 = vmatpush3.bf16.msra.mxu1 %v4010_v46  ;;  %2633 = vmatprep.mubr.f32.mxu1 %v2960_v59  ;;  %v2793_v43 = vpack.c.bf16 %v1937_v22, %v1936_v48 }
 0x541   :  { %v2199_v63 = vrot.slane %v2185_v54, %v4237_v61  ;;  %v2200_v30 = vcombine.high %v2192_v41, %v2192_v41  ;;  %v2208_v57 = vrot.slane %v2192_v41, %v4237_v61  ;;  %2746 = vmatprep.subr.bf16.mxu1 %v2745_v9  ;;  %v1938_v54 = vld [vmem:[#allocation13 + $0x60] sm:$0xff]  ;;  %v1939_v41 = vld [vmem:[#allocation13 + $0x68] sm:$0xff] }
 0x542   :  { %v2318_v20 = vld [vmem:[#allocation4 + $0x8] sm:$0xff]  ;;  %v2797_v59 = vpack.c.bf16 %v1939_v41, %v1938_v54 }
 0x543   :  { %v2201_v39 = vcombine.high %v2199_v63, %v2199_v63  ;;  %v2215_v23 = vrot.slane %v2199_v63, %v4237_v61  ;;  %v2222_v11 = vrot.slane %v2200_v30, %v4237_v61  ;;  %v2230_v10 = vcombine.high %v2208_v57, %v2208_v57  ;;  %2243 = vst.msk [vmem:[#allocation17] sm:$0x1] %vm2242_vm10, %v2208_v57  ;;  %v1940_v63 = vld [vmem:[#allocation13 + $0x70] sm:$0xff]  ;;  %v1941_v30 = vld [vmem:[#allocation13 + $0x78] sm:$0xff] }
 0x544   :  { %2599 = vmatmul.mubr.msk.f32.vlgmr.msra.gmra.mrb[6].mxu0 %vm889_vm8, %v2318_v20  ;;  %v2320_v46 = vcombine.high %v2318_v20, %v2318_v20  ;;  %v2327_v60 = vrot.slane %v2318_v20, %v4237_v61  ;;  %2748 = vmatpush3.bf16.msra.mxu1 %v2745_v9  ;;  %v2789_v9 = vpack.c.bf16 %v1935_v21, %v1934_v58 }
 0x545   :  { %v2229_v32 = vrot.slane %v2201_v39, %v4237_v61  ;;  %v2231_v3 = vcombine.high %v2215_v23, %v2215_v23  ;;  %v2232_v55 = vcombine.high %v2222_v11, %v2222_v11  ;;  %2244 = vst.msk [vmem:[#allocation17 + $0x2] sm:$0x1] %vm2242_vm10, %v2222_v11  ;;  %2245 = vst.msk [vmem:[#allocation17 + $0x4] sm:$0x1] %vm2242_vm10, %v2230_v10  ;;  %2750 = vmatprep.subr.bf16.mxu1 %v2749_v37 }
 0x546   :  { %2247 = vst.msk [vmem:[#allocation17 + $0x8] sm:$0x1] %vm2242_vm10, %v2215_v23  ;;  %v2334_v34 = vrot.slane %v2320_v46, %v4237_v61  ;;  %v2335_v27 = vcombine.high %v2327_v60, %v2327_v60  ;;  %v2343_v5 = vrot.slane %v2327_v60, %v4237_v61  ;;  %v2801_v57 = vpack.c.bf16 %v1941_v30, %v1940_v63 }
 0x547   :  { %v2233_v17 = vcombine.high %v2229_v32, %v2229_v32  ;;  %2246 = vst.msk [vmem:[#allocation17 + $0x6] sm:$0x1] %vm2242_vm10, %v2232_v55  ;;  %2248 = vst.msk [vmem:[#allocation17 + $0xa] sm:$0x1] %vm2242_vm10, %v2229_v32 }
 0x548   :  { %2249 = vst.msk [vmem:[#allocation17 + $0xc] sm:$0x1] %vm2242_vm10, %v2231_v3  ;;  %v2336_v26 = vcombine.high %v2334_v34, %v2334_v34  ;;  %v2350_v45 = vrot.slane %v2334_v34, %v4237_v61  ;;  %v2357_v25 = vrot.slane %v2335_v27, %v4237_v61  ;;  %v2365_v33 = vcombine.high %v2343_v5, %v2343_v5 }
 0x549   :  { %2377 = vst.msk [vmem:[#allocation17 + $0x1] sm:$0x1] %vm2242_vm10, %v2343_v5  ;;  %2752 = vmatpush3.bf16.msra.mxu1 %v2749_v37  ;;  %2250 = vst.msk [vmem:[#allocation17 + $0xe] sm:$0x1] %vm2242_vm10, %v2233_v17 }
 0x54a   :  { %2754 = vmatprep.subr.bf16.mxu1 %v2753_v8  ;;  %v2364_v36 = vrot.slane %v2336_v26, %v4237_v61  ;;  %v2366_v53 = vcombine.high %v2350_v45, %v2350_v45  ;;  %v2367_v1 = vcombine.high %v2357_v25, %v2357_v25  ;;  %2378 = vst.msk [vmem:[#allocation17 + $0x3] sm:$0x1] %vm2242_vm10, %v2357_v25  ;;  %2379 = vst.msk [vmem:[#allocation17 + $0x5] sm:$0x1] %vm2242_vm10, %v2365_v33 }
 0x54b   :  { %2381 = vst.msk [vmem:[#allocation17 + $0x9] sm:$0x1] %vm2242_vm10, %v2350_v45 }
 0x54c   :  { %v2368_v0 = vcombine.high %v2364_v36, %v2364_v36  ;;  %2380 = vst.msk [vmem:[#allocation17 + $0x7] sm:$0x1] %vm2242_vm10, %v2367_v1  ;;  %2382 = vst.msk [vmem:[#allocation17 + $0xb] sm:$0x1] %vm2242_vm10, %v2364_v36 }
 0x54d   :  { %2383 = vst.msk [vmem:[#allocation17 + $0xd] sm:$0x1] %vm2242_vm10, %v2366_v53  ;;  %2756 = vmatpush3.bf16.msra.mxu1 %v2753_v8 }
 0x54e   :  { %2758 = vmatprep.subr.bf16.mxu1 %v2757_v2  ;;  %2384 = vst.msk [vmem:[#allocation17 + $0xf] sm:$0x1] %vm2242_vm10, %v2368_v0 }
 0x551   :  { %2760 = vmatpush3.bf16.msra.mxu1 %v2757_v2 }
 0x552   :  { %2762 = vmatprep.subr.bf16.mxu1 %v2761_v13 }
 0x555   :  { %2764 = vmatpush3.bf16.msra.mxu1 %v2761_v13 }
 0x556   :  { %2766 = vmatprep.subr.bf16.mxu1 %v2765_v44 }
 0x559   :  { %2768 = vmatpush3.bf16.msra.mxu1 %v2765_v44 }
 0x55a   :  { %2770 = vmatprep.subr.bf16.mxu1 %v2769_v29 }
 0x55d   :  { %2772 = vmatpush3.bf16.msra.mxu1 %v2769_v29 }
 0x55e   :  { %2774 = vmatprep.subr.bf16.mxu1 %v2773_v6 }
 0x560   :  { %2634 = vmatmul.mubr.f32.vlgmr.msra.gmra.mrb[2].mxu1 %v2961_v31 }
 0x561   :  { %2776 = vmatpush3.bf16.msra.mxu1 %v2773_v6 }
 0x562   :  { %2778 = vmatprep.subr.bf16.mxu1 %v2777_v40 }
 0x565   :  { %2780 = vmatpush3.bf16.msra.mxu1 %v2777_v40 }
 0x566   :  { %2782 = vmatprep.subr.bf16.mxu1 %v2781_v35 }
 0x569   :  { %2784 = vmatpush3.bf16.msra.mxu1 %v2781_v35 }
 0x56a   :  { %2786 = vmatprep.subr.bf16.mxu1 %v2785_v19 }
 0x56d   :  { %2788 = vmatpush3.bf16.msra.mxu1 %v2785_v19 }
 0x56e   :  { %2790 = vmatprep.subr.bf16.mxu1 %v2789_v9 }
 0x571   :  { %2792 = vmatpush3.bf16.msra.mxu1 %v2789_v9 }
 0x572   :  { %2794 = vmatprep.subr.bf16.mxu1 %v2793_v43 }
 0x575   :  { %2796 = vmatpush3.bf16.msra.mxu1 %v2793_v43 }
 0x576   :  { %2798 = vmatprep.subr.bf16.mxu1 %v2797_v59 }
 0x579   :  { %2800 = vmatpush3.bf16.msra.mxu1 %v2797_v59 }
 0x57a   :  { %2802 = vmatprep.subr.bf16.mxu1 %v2801_v57 }
 0x57d   :  { %2804 = vmatpush3.bf16.msra.mxu1 %v2801_v57 }
 0x612   :  { %v1849_v37 = vpop.f32.mrb[0].mxu1 }
 0x613   :  { %v2593_v20 = vpop.f32.mrb[1].mxu1  ;;  %2668 = vmatprep.mubr.f32.mxu1 %v1849_v37 }
 0x617   :  { %v1922_v15 = vpop.f32.mrb[6].mxu0 }
 0x618   :  { %v2600_v47 = vpop.f32.mrb[7].mxu0  ;;  %2669 = vmatmul.mubr.f32.vlgmr.msra.gmra.mrb[2].mxu1 %v1922_v15 }
 0x619   :  { %3105 = shalt.err (!%p3102_p10)
}
 0x61a   :  { %s3106_s30 = scalar_lea.hbm %s4187_s10, 256 }
 0x61b   :  { %p3107_p11 = scmp.ne.s32.totalorder %s4187_s10, %s3106_s30  ;;  %p3110_p12 = scmp.lt.u32.totalorder %s3106_s30, %s4187_s10 }
 0x61d   :  { %p3112_p13 = pnand %p3110_p12, %p3107_p11 }
 0x61f   :  { %3115 = shalt.err (!%p3112_p13)
}
 0x620   :  { %s3164_s13 = smov 32   ;;  %s3165_s2 = smov 2   ;;  %v2425_v39 = vld [vmem:[%s4185_s8] ss:$0 sm:$0xff] }
 0x621   :  { %2408 = dma.vmem_to_hbm [thread:$0]  %s2403_s24, 256, %s4187_s10, [#allocation18], %s3164_s13, %s3164_s13, %s3165_s2  }
 0x622   :  { %s3166_s8 = smov [#allocation16]  }
 0x623   :  { %s2390_s10 = sshll.u32 %s3166_s8, 4  ;;  %s2391_s10 = int_to_ptr.vmem [resolvable:$true] %s2390_s10 }
 0x624   :  { %s3116_s1 = scalar_lea.vmem %s2391_s10, 256  ;;  %p3121_p1 = scmp.lt.s32.totalorder %s2391_s10, %s2391_s10 }
 0x625   :  { %p3117_p0 = scmp.ne.s32.totalorder %s2391_s10, %s3116_s1  ;;  %p3122_p2 = scmp.lt.s32.totalorder %s3116_s1, %s3116_s1 }
 0x627   :  { %p3123_p3 = por %p3122_p2, %p3121_p1 }
 0x629   :  { %p3124_p4 = pnand %p3123_p3, %p3117_p0 }
 0x6eb   :  { %v2670_v23 = vpop.f32.mrb[2].mxu1 }
 0x6ec   :  { %v2116_v11 = vadd.f32 %v2670_v23, %v2425_v39  ;;  %v2099_v10 = vpop.f32.mrb[3].mxu1 }
 0x6ed   :  { %v2115_v46 = vadd.f32 %v2425_v39, %v2099_v10 }
 0x6ee   :  { %v2252_v60 = vcombine.high %v2116_v11, %v2116_v11  ;;  %v2259_v32 = vrot.slane %v2116_v11, %v4237_v61 }
 0x6ef   :  { %v2118_v3 = vcombine.high %v2115_v46, %v2115_v46  ;;  %v2125_v55 = vrot.slane %v2115_v46, %v4237_v61 }
 0x6f0   :  { %v2266_v8 = vrot.slane %v2252_v60, %v4237_v61  ;;  %v2267_v34 = vcombine.high %v2259_v32, %v2259_v32  ;;  %v2275_v27 = vrot.slane %v2259_v32, %v4237_v61  ;;  %2430 = vst.sshfl [vmem:[#allocation16 + $0x1] sm:$0x1 pattern:$0x73625140] %v2259_v32 }
 0x6f1   :  { %v2132_v5 = vrot.slane %v2118_v3, %v4237_v61  ;;  %v2133_v18 = vcombine.high %v2125_v55, %v2125_v55  ;;  %v2141_v51 = vrot.slane %v2125_v55, %v4237_v61  ;;  %2426 = vst.sshfl [vmem:[#allocation16] sm:$0x1 pattern:$0x73625140] %v2125_v55 }
 0x6f2   :  { %v2268_v17 = vcombine.high %v2266_v8, %v2266_v8  ;;  %v2282_v26 = vrot.slane %v2266_v8, %v4237_v61  ;;  %v2289_v45 = vrot.slane %v2267_v34, %v4237_v61  ;;  %v2297_v25 = vcombine.high %v2275_v27, %v2275_v27  ;;  %2431 = vst.sshfl [vmem:[#allocation16 + $0x3] sm:$0x1 pattern:$0x73625140] %v2267_v34 }
 0x6f3   :  { %2432 = vst.sshfl [vmem:[#allocation16 + $0x9] sm:$0x1 pattern:$0x73625140] %v2266_v8  ;;  %v2134_v33 = vcombine.high %v2132_v5, %v2132_v5  ;;  %v2148_v2 = vrot.slane %v2132_v5, %v4237_v61  ;;  %v2155_v36 = vrot.slane %v2133_v18, %v4237_v61  ;;  %v2163_v53 = vcombine.high %v2141_v51, %v2141_v51 }
 0x6f4   :  { %2427 = vst.sshfl [vmem:[#allocation16 + $0x2] sm:$0x1 pattern:$0x73625140] %v2133_v18  ;;  %v2296_v1 = vrot.slane %v2268_v17, %v4237_v61  ;;  %v2298_v28 = vcombine.high %v2282_v26, %v2282_v26  ;;  %v2299_v42 = vcombine.high %v2289_v45, %v2289_v45  ;;  %2311 = vst [vmem:[#allocation16 + $0x5] sm:$0x1] %v2297_v25 }
 0x6f5   :  { %2428 = vst.sshfl [vmem:[#allocation16 + $0x8] sm:$0x1 pattern:$0x73625140] %v2132_v5  ;;  %v2162_v0 = vrot.slane %v2134_v33, %v4237_v61  ;;  %v2164_v13 = vcombine.high %v2148_v2, %v2148_v2  ;;  %v2165_v24 = vcombine.high %v2155_v36, %v2155_v36  ;;  %2177 = vst [vmem:[#allocation16 + $0x4] sm:$0x1] %v2163_v53 }
 0x6f6   :  { %2433 = vst.sshfl [vmem:[#allocation16 + $0xb] sm:$0x1 pattern:$0x73625140] %v2268_v17  ;;  %v2300_v49 = vcombine.high %v2296_v1, %v2296_v1  ;;  %2312 = vst [vmem:[#allocation16 + $0x7] sm:$0x1] %v2299_v42 }
 0x6f7   :  { %2429 = vst.sshfl [vmem:[#allocation16 + $0xa] sm:$0x1 pattern:$0x73625140] %v2134_v33  ;;  %2315 = vst [vmem:[#allocation16 + $0xd] sm:$0x1] %v2298_v28  ;;  %v2166_v44 = vcombine.high %v2162_v0, %v2162_v0 }
 0x6f8   :  { %2178 = vst [vmem:[#allocation16 + $0x6] sm:$0x1] %v2165_v24  ;;  %2181 = vst [vmem:[#allocation16 + $0xc] sm:$0x1] %v2164_v13 }
 0x6f9   :  { %2316 = vst [vmem:[#allocation16 + $0xf] sm:$0x1] %v2300_v49  ;;  %2182 = vst [vmem:[#allocation16 + $0xe] sm:$0x1] %v2166_v44 }
 0x6fa   :  { %3127 = shalt.err (!%p3124_p4)
}
 0x6fb   :  { %s3128_s21 = scalar_lea.hbm %s4186_s9, 256 }
 0x6fc   :  { %p3129_p5 = scmp.ne.s32.totalorder %s4186_s9, %s3128_s21  ;;  %p3132_p6 = scmp.lt.u32.totalorder %s3128_s21, %s4186_s9 }
 0x6fe   :  { %p3134_p7 = pnand %p3132_p6, %p3129_p5 }
 0x700   :  { %3137 = shalt.err (!%p3134_p7)
}
 0x701   :  { %2396 = dma.vmem_to_hbm [thread:$0]  %s2391_s10, 256, %s4186_s9, [#allocation7], %s3164_s13, %s3164_s13, %s3165_s2  }
 0x702   :  { %3146 = dma.done.wait [#allocation7], 256  }
 0x703   :  { %3147 = vsyncadd [#allocation7], 4294967040 }
 0x704   :  { %3148 = dma.done.wait [#allocation18], 256  }
 0x705   :  { %3149 = vsyncadd [#allocation18], 4294967040 }
 0x706   :  { %2415 = vsyncpa [#allocation6], 1 }
 0x707   :  { %2416 = vsyncpa [#allocation9], 1 }
 0x708   :  { %2417 = vsyncpa [#allocation12], 1 }
 0x709   :  { %2418 = vsyncpa [#allocation15], 1 }
 0x70a   :  { %2419 = vsyncpa [#allocation7], 1 }
 0x70b   :  { %2420 = vsyncpa [#allocation18], 1 }

</bundles_post_ra>
